<compile_context>
chip_gen: v5e
topology: v5e:2x2
jax: 0.10.0
libtpu: 0.0.40
codegen_flags: <defaults>
</compile_context>

<pallas_src>
import jax
import jax.numpy as jnp
from jax.experimental import pallas as pl
from jax.experimental.pallas import tpu as pltpu

# ---- hyperparameters (small, consistent with the module's shapes) -----------
VOCAB_SIZE = 65
N_EMBD = 32
N_HEADS = 4                      # ATTENTION_HEADS
HEAD_SIZE = N_EMBD // N_HEADS    # 8
BLOCK_SIZE = 8
N_LAYERS = 2
LN_EPS = 1e-5                    # nn.LayerNorm default
V_PAD = 128                      # lane-dense padded vocab for the kernel output
PER_LAYER_TENSORS = 11           # tensors per transformer block (see init_params)
NEG_INF = -1e30                  # additive mask value (finite: avoids inf-inf NaNs)


def _layer_norm(x, gamma, beta):
    mu = jnp.mean(x, axis=-1, keepdims=True)
    var = jnp.mean((x - mu) ** 2, axis=-1, keepdims=True)
    return (x - mu) * jax.lax.rsqrt(var + LN_EPS) * gamma + beta


# ---------------------------- fused Pallas kernel -----------------------------
def fused_forward_kernel(idx_ref, tok_ref, pos_ref, mask_ref, *refs):
    """Full forward pass for one batch element (grid axis 0 = batch).

    idx_ref  : (B, T) int32 in SMEM (scalar prefetch)
    tok_ref  : (VOCAB, E) VMEM     pos_ref : (T, E) VMEM
    mask_ref : (H*T, H*T) additive attention bias (0 / -1e30), built host-side
    refs     : N_LAYERS * 11 block tensors, lnf_g, lnf_b, w_lm_pad, b_lm_pad, out
    """
    out_ref = refs[-1]
    lnf_g, lnf_b, w_lm, b_lm = refs[-5:-1]
    layer_refs = refs[:-5]

    b = pl.program_id(0)
    T = out_ref.shape[0]
    E = N_EMBD
    H, D = N_HEADS, HEAD_SIZE

    # ---- embedding gather: dynamic token-row loads + positional rows --------
    tok_rows = [tok_ref[pl.ds(idx_ref[b, t], 1), :] for t in range(T)]
    x = jnp.concatenate(tok_rows, axis=0).astype(jnp.float32) + pos_ref[...]

    # ---- mask / scale hoisted once (mask precomputed host-side) --------------
    mask_bias = mask_ref[...]                 # (H*T, H*T), loaded once per grid step
    scale = float(N_EMBD) ** -0.5             # torch Head scales by C**-0.5, C == N_EMBD

    for layer in range(N_LAYERS):
        (ln1g, ln1b, w_qkv, w_proj, b_proj,
         ln2g, ln2b, w_ff1, b_ff1, w_ff2, b_ff2) = layer_refs[
            layer * PER_LAYER_TENSORS:(layer + 1) * PER_LAYER_TENSORS]

        # -------- x + MultiHeadAttention(LN1(x)) --------
        h1 = _layer_norm(x, ln1g[...], ln1b[...])
        qkv = jnp.dot(h1, w_qkv[...], preferred_element_type=jnp.float32)  # (T, 3E)

        # stack heads along the sublane axis: (T, E) -> (H*T, D); fold scale into q
        q_s = jnp.concatenate(
            [qkv[:, h_ * D:(h_ + 1) * D] for h_ in range(H)], axis=0) * scale
        k_s = jnp.concatenate(
            [qkv[:, E + h_ * D:E + (h_ + 1) * D] for h_ in range(H)], axis=0)
        v_s = jnp.concatenate(
            [qkv[:, 2 * E + h_ * D:2 * E + (h_ + 1) * D] for h_ in range(H)], axis=0)

        # all heads in one (H*T, D) x (D, H*T) matmul; cross-head / future entries
        # are knocked out by the precomputed additive bias
        s = jnp.einsum('td,sd->ts', q_s, k_s,
                       preferred_element_type=jnp.float32) + mask_bias      # (HT, HT)
        s = s - jnp.max(s, axis=-1, keepdims=True)
        p = jnp.exp(s)
        denom = jnp.sum(p, axis=-1, keepdims=True)
        o_s = jnp.dot(p, v_s, preferred_element_type=jnp.float32)           # (HT, D)
        o_s = o_s * pl.reciprocal(denom, approx=True)   # softmax denom on the EUP

        # un-stack heads back to (T, E) (sublane-aligned slices)
        attn = jnp.concatenate(
            [o_s[h_ * T:(h_ + 1) * T, :] for h_ in range(H)], axis=1)
        attn = jnp.dot(attn, w_proj[...],
                       preferred_element_type=jnp.float32) + b_proj[...]
        x = x + attn

        # -------- x + FeedForward(LN2(x)) --------
        h2 = _layer_norm(x, ln2g[...], ln2b[...])
        ff = jnp.dot(h2, w_ff1[...], preferred_element_type=jnp.float32) + b_ff1[...]
        ff = jnp.maximum(ff, 0.0)
        ff = jnp.dot(ff, w_ff2[...], preferred_element_type=jnp.float32) + b_ff2[...]
        x = x + ff

    # -------- final LayerNorm + lm_head (vocab padded to 128 lanes) --------
    hf = _layer_norm(x, lnf_g[...], lnf_b[...])
    logits = jnp.dot(hf, w_lm[...], preferred_element_type=jnp.float32) + b_lm[...]
    out_ref[...] = logits.astype(out_ref.dtype)          # (T, 128): unmasked stores


# ---------------------------- wrapper ------------------------------------------
def _full_spec(a):
    # whole (small) weight tensor resident in VMEM; index_map gets (b, idx_ref)
    return pl.BlockSpec(a.shape, lambda b, idx_ref, nd=a.ndim: (0,) * nd)


def _build_mask_bias(T):
    """Additive mask for sublane-stacked heads: 0 if (same head AND causal), else -1e30."""
    ht = N_HEADS * T
    r = jnp.arange(ht)[:, None]
    c = jnp.arange(ht)[None, :]
    valid = jnp.logical_and(r // T == c // T, c % T <= r % T)
    return jnp.where(valid, 0.0, NEG_INF).astype(jnp.float32)


def forward(idx, params, targets=None):
    B, T = idx.shape
    assert T == BLOCK_SIZE, "this fused kernel is built for T == BLOCK_SIZE"

    flat_weights = []
    for bp in params['blocks']:
        flat_weights.extend(bp)
    mask_bias = _build_mask_bias(T)
    operands = [params['tok_emb'], params['pos_emb'], mask_bias, *flat_weights,
                params['lnf_g'], params['lnf_b'],
                params['w_lm_p'], params['b_lm_p']]

    in_specs = [_full_spec(params['tok_emb']),
                pl.BlockSpec((T, N_EMBD), lambda b, idx_ref: (0, 0)),
                _full_spec(mask_bias)]
    in_specs += [_full_spec(a) for a in flat_weights]
    in_specs += [_full_spec(params['lnf_g']), _full_spec(params['lnf_b']),
                 _full_spec(params['w_lm_p']), _full_spec(params['b_lm_p'])]

    logits_pad = pl.pallas_call(
        fused_forward_kernel,
        out_shape=jax.ShapeDtypeStruct((B, T, V_PAD), jnp.float32),
        grid_spec=pltpu.PrefetchScalarGridSpec(
            num_scalar_prefetch=1,            # idx -> SMEM
            grid=(B,),                        # 2-way parallel keeps both v7x TCs busy
            in_specs=in_specs,
            out_specs=pl.BlockSpec((None, T, V_PAD), lambda b, idx_ref: (b, 0, 0)),
        ),
        compiler_params=pltpu.CompilerParams(dimension_semantics=("parallel",)),
    )(idx.astype(jnp.int32), *operands)

    # drop the lane padding BEFORE any softmax/loss so padded columns never leak
    logits = logits_pad[:, :, :VOCAB_SIZE]
    if targets is None:
        return logits, None
    logp = jax.nn.log_softmax(logits.reshape(B * T, VOCAB_SIZE), axis=-1)
    loss = -jnp.mean(jnp.take_along_axis(logp, targets.reshape(-1, 1), axis=-1))
    return logits, loss


# ---------------------------- reference (pure JAX) ------------------------------
def ref_forward(idx, params):
    B, T = idx.shape
    x = params['tok_emb'][idx] + params['pos_emb'][jnp.arange(T)]
    mask = jnp.tril(jnp.ones((T, T), dtype=bool))
    scale = float(N_EMBD) ** -0.5
    for (ln1g, ln1b, wqkv, wp, bp,
         ln2g, ln2b, w1, b1, w2, b2) in params['blocks']:
        h = _layer_norm(x, ln1g, ln1b)
        q = h @ wqkv[:, :N_EMBD]
        k = h @ wqkv[:, N_EMBD:2 * N_EMBD]
        v = h @ wqkv[:, 2 * N_EMBD:]
        outs = []
        for hd in range(N_HEADS):
            s = slice(hd * HEAD_SIZE, (hd + 1) * HEAD_SIZE)
            wei = jnp.einsum('btd,bsd->bts', q[..., s], k[..., s]) * scale
            wei = jnp.where(mask, wei, -jnp.inf)
            p = jax.nn.softmax(wei, axis=-1)
            outs.append(jnp.einsum('bts,bsd->btd', p, v[..., s]))
        x = x + (jnp.concatenate(outs, axis=-1) @ wp + bp)
        h2 = _layer_norm(x, ln2g, ln2b)
        x = x + (jnp.maximum(h2 @ w1 + b1, 0.0) @ w2 + b2)
    h = _layer_norm(x, params['lnf_g'], params['lnf_b'])
    return h @ params['w_lm_p'][:, :VOCAB_SIZE] + params['b_lm_p'][:, :VOCAB_SIZE]


# ---------------------------- parameter init ------------------------------------
def init_params(key):
    keys = iter(jax.random.split(key, 64))

    def nrm(shape, std=0.02):
        return jax.random.normal(next(keys), shape, jnp.float32) * std

    E, HID = N_EMBD, 4 * N_EMBD
    blocks = []
    for _ in range(N_LAYERS):
        blocks.append((
            jnp.ones((1, E), jnp.float32),    # ln1 gamma
            jnp.zeros((1, E), jnp.float32),   # ln1 beta
            nrm((E, 3 * E)),                  # fused [Wq | Wk | Wv], (in, out), no bias
            nrm((E, E)),                      # attn proj W
            nrm((1, E)),                      # attn proj b
            jnp.ones((1, E), jnp.float32),    # ln2 gamma
            jnp.zeros((1, E), jnp.float32),   # ln2 beta
            nrm((E, HID)),                    # ffn W1
            nrm((1, HID)),                    # ffn b1
            nrm((HID, E)),                    # ffn W2
            nrm((1, E)),                      # ffn b2
        ))
    w_lm = nrm((E, VOCAB_SIZE))
    b_lm = nrm((1, VOCAB_SIZE))
    w_lm_p = jnp.zeros((E, V_PAD), jnp.float32).at[:, :VOCAB_SIZE].set(w_lm)
    b_lm_p = jnp.zeros((1, V_PAD), jnp.float32).at[:, :VOCAB_SIZE].set(b_lm)
    return {
        'tok_emb': nrm((VOCAB_SIZE, E)),
        'pos_emb': nrm((BLOCK_SIZE, E)),
        'blocks': blocks,
        'lnf_g': jnp.ones((1, E), jnp.float32),
        'lnf_b': jnp.zeros((1, E), jnp.float32),
        'w_lm_p': w_lm_p,                     # lane-padded lm_head weight (E, 128)
        'b_lm_p': b_lm_p,                     # lane-padded lm_head bias   (1, 128)
    }


# ---------------------------- main ----------------------------------------------
if __name__ == "__main__":
    key = jax.random.PRNGKey(0)
    kp, ki = jax.random.split(key)
    params = init_params(kp)

    B, T = 2, BLOCK_SIZE
    idx = jax.random.randint(ki, (B, T), 0, VOCAB_SIZE, dtype=jnp.int32)

    logits, loss = forward(idx, params)          # targets=None -> loss is None
    logits = jax.block_until_ready(logits)

    assert logits.shape == (B, T, VOCAB_SIZE), logits.shape
    assert loss is None
    ref = ref_forward(idx, params)
    max_err = float(jnp.max(jnp.abs(logits - ref)))
    # slightly loose tolerance accounts for pl.reciprocal(approx=True) in softmax
    assert jnp.allclose(logits, ref, atol=5e-4, rtol=5e-4), max_err

    # TODO(synk): generate()'s torch.multinomial sampling loop is host-side glue,
    # not a kernel; it is intentionally omitted.  Dropout is identity at inference.
    print("KERNEL_OK")
</pallas_src>

<mosaic_0001>
module attributes {stable_mosaic.version = 11 : i64} {
  func.func @fused_forward_kernel(%arg0: i32, %arg1: memref<2x8xi32, #tpu.memory_space<smem>>, %arg2: memref<65x32xf32, #tpu.memory_space<vmem>>, %arg3: memref<8x32xf32, #tpu.memory_space<vmem>>, %arg4: memref<32x32xf32, #tpu.memory_space<vmem>>, %arg5: memref<1x32xf32, #tpu.memory_space<vmem>>, %arg6: memref<1x32xf32, #tpu.memory_space<vmem>>, %arg7: memref<32x96xf32, #tpu.memory_space<vmem>>, %arg8: memref<32x32xf32, #tpu.memory_space<vmem>>, %arg9: memref<1x32xf32, #tpu.memory_space<vmem>>, %arg10: memref<1x32xf32, #tpu.memory_space<vmem>>, %arg11: memref<1x32xf32, #tpu.memory_space<vmem>>, %arg12: memref<32x128xf32, #tpu.memory_space<vmem>>, %arg13: memref<1x128xf32, #tpu.memory_space<vmem>>, %arg14: memref<128x32xf32, #tpu.memory_space<vmem>>, %arg15: memref<1x32xf32, #tpu.memory_space<vmem>>, %arg16: memref<1x32xf32, #tpu.memory_space<vmem>>, %arg17: memref<1x32xf32, #tpu.memory_space<vmem>>, %arg18: memref<32x96xf32, #tpu.memory_space<vmem>>, %arg19: memref<32x32xf32, #tpu.memory_space<vmem>>, %arg20: memref<1x32xf32, #tpu.memory_space<vmem>>, %arg21: memref<1x32xf32, #tpu.memory_space<vmem>>, %arg22: memref<1x32xf32, #tpu.memory_space<vmem>>, %arg23: memref<32x128xf32, #tpu.memory_space<vmem>>, %arg24: memref<1x128xf32, #tpu.memory_space<vmem>>, %arg25: memref<128x32xf32, #tpu.memory_space<vmem>>, %arg26: memref<1x32xf32, #tpu.memory_space<vmem>>, %arg27: memref<1x32xf32, #tpu.memory_space<vmem>>, %arg28: memref<1x32xf32, #tpu.memory_space<vmem>>, %arg29: memref<32x128xf32, #tpu.memory_space<vmem>>, %arg30: memref<1x128xf32, #tpu.memory_space<vmem>>, %arg31: memref<1x8x128xf32, #tpu.memory_space<vmem>>) attributes {dimension_semantics = [#tpu.dimension_semantics<parallel>], iteration_bounds = array<i64: 2>, scalar_prefetch = 1 : i64, scratch_operands = 0 : i64, tpu.core_type = #tpu.core_type<tc>, window_params = [{pipeline_mode = #tpu.pipeline_mode<synchronous>, transform_indices = @transform_0, window_bounds = array<i64: 65, 32>}, {pipeline_mode = #tpu.pipeline_mode<synchronous>, transform_indices = @transform_1, window_bounds = array<i64: 8, 32>}, {pipeline_mode = #tpu.pipeline_mode<synchronous>, transform_indices = @transform_2, window_bounds = array<i64: 32, 32>}, {pipeline_mode = #tpu.pipeline_mode<synchronous>, transform_indices = @transform_3, window_bounds = array<i64: 1, 32>}, {pipeline_mode = #tpu.pipeline_mode<synchronous>, transform_indices = @transform_4, window_bounds = array<i64: 1, 32>}, {pipeline_mode = #tpu.pipeline_mode<synchronous>, transform_indices = @transform_5, window_bounds = array<i64: 32, 96>}, {pipeline_mode = #tpu.pipeline_mode<synchronous>, transform_indices = @transform_6, window_bounds = array<i64: 32, 32>}, {pipeline_mode = #tpu.pipeline_mode<synchronous>, transform_indices = @transform_7, window_bounds = array<i64: 1, 32>}, {pipeline_mode = #tpu.pipeline_mode<synchronous>, transform_indices = @transform_8, window_bounds = array<i64: 1, 32>}, {pipeline_mode = #tpu.pipeline_mode<synchronous>, transform_indices = @transform_9, window_bounds = array<i64: 1, 32>}, {pipeline_mode = #tpu.pipeline_mode<synchronous>, transform_indices = @transform_10, window_bounds = array<i64: 32, 128>}, {pipeline_mode = #tpu.pipeline_mode<synchronous>, transform_indices = @transform_11, window_bounds = array<i64: 1, 128>}, {pipeline_mode = #tpu.pipeline_mode<synchronous>, transform_indices = @transform_12, window_bounds = array<i64: 128, 32>}, {pipeline_mode = #tpu.pipeline_mode<synchronous>, transform_indices = @transform_13, window_bounds = array<i64: 1, 32>}, {pipeline_mode = #tpu.pipeline_mode<synchronous>, transform_indices = @transform_14, window_bounds = array<i64: 1, 32>}, {pipeline_mode = #tpu.pipeline_mode<synchronous>, transform_indices = @transform_15, window_bounds = array<i64: 1, 32>}, {pipeline_mode = #tpu.pipeline_mode<synchronous>, transform_indices = @transform_16, window_bounds = array<i64: 32, 96>}, {pipeline_mode = #tpu.pipeline_mode<synchronous>, transform_indices = @transform_17, window_bounds = array<i64: 32, 32>}, {pipeline_mode = #tpu.pipeline_mode<synchronous>, transform_indices = @transform_18, window_bounds = array<i64: 1, 32>}, {pipeline_mode = #tpu.pipeline_mode<synchronous>, transform_indices = @transform_19, window_bounds = array<i64: 1, 32>}, {pipeline_mode = #tpu.pipeline_mode<synchronous>, transform_indices = @transform_20, window_bounds = array<i64: 1, 32>}, {pipeline_mode = #tpu.pipeline_mode<synchronous>, transform_indices = @transform_21, window_bounds = array<i64: 32, 128>}, {pipeline_mode = #tpu.pipeline_mode<synchronous>, transform_indices = @transform_22, window_bounds = array<i64: 1, 128>}, {pipeline_mode = #tpu.pipeline_mode<synchronous>, transform_indices = @transform_23, window_bounds = array<i64: 128, 32>}, {pipeline_mode = #tpu.pipeline_mode<synchronous>, transform_indices = @transform_24, window_bounds = array<i64: 1, 32>}, {pipeline_mode = #tpu.pipeline_mode<synchronous>, transform_indices = @transform_25, window_bounds = array<i64: 1, 32>}, {pipeline_mode = #tpu.pipeline_mode<synchronous>, transform_indices = @transform_26, window_bounds = array<i64: 1, 32>}, {pipeline_mode = #tpu.pipeline_mode<synchronous>, transform_indices = @transform_27, window_bounds = array<i64: 32, 128>}, {pipeline_mode = #tpu.pipeline_mode<synchronous>, transform_indices = @transform_28, window_bounds = array<i64: 1, 128>}, {transform_indices = @transform_29, window_bounds = array<i64: 1, 8, 128>}]} {
    %0 = arith.index_cast %arg0 : i32 to index
    %c0 = arith.constant 0 : index
    %1 = memref.load %arg1[%0, %c0] : memref<2x8xi32, #tpu.memory_space<smem>>
    %2 = arith.index_cast %1 : i32 to index
    %c0_0 = arith.constant 0 : index
    %3 = vector.load %arg2[%2, %c0_0] : memref<65x32xf32, #tpu.memory_space<vmem>>, vector<1x32xf32>
    %4 = arith.index_cast %arg0 : i32 to index
    %c1 = arith.constant 1 : index
    %5 = memref.load %arg1[%4, %c1] : memref<2x8xi32, #tpu.memory_space<smem>>
    %6 = arith.index_cast %5 : i32 to index
    %c0_1 = arith.constant 0 : index
    %7 = vector.load %arg2[%6, %c0_1] : memref<65x32xf32, #tpu.memory_space<vmem>>, vector<1x32xf32>
    %8 = arith.index_cast %arg0 : i32 to index
    %c2 = arith.constant 2 : index
    %9 = memref.load %arg1[%8, %c2] : memref<2x8xi32, #tpu.memory_space<smem>>
    %10 = arith.index_cast %9 : i32 to index
    %c0_2 = arith.constant 0 : index
    %11 = vector.load %arg2[%10, %c0_2] : memref<65x32xf32, #tpu.memory_space<vmem>>, vector<1x32xf32>
    %12 = arith.index_cast %arg0 : i32 to index
    %c3 = arith.constant 3 : index
    %13 = memref.load %arg1[%12, %c3] : memref<2x8xi32, #tpu.memory_space<smem>>
    %14 = arith.index_cast %13 : i32 to index
    %c0_3 = arith.constant 0 : index
    %15 = vector.load %arg2[%14, %c0_3] : memref<65x32xf32, #tpu.memory_space<vmem>>, vector<1x32xf32>
    %16 = arith.index_cast %arg0 : i32 to index
    %c4 = arith.constant 4 : index
    %17 = memref.load %arg1[%16, %c4] : memref<2x8xi32, #tpu.memory_space<smem>>
    %18 = arith.index_cast %17 : i32 to index
    %c0_4 = arith.constant 0 : index
    %19 = vector.load %arg2[%18, %c0_4] : memref<65x32xf32, #tpu.memory_space<vmem>>, vector<1x32xf32>
    %20 = arith.index_cast %arg0 : i32 to index
    %c5 = arith.constant 5 : index
    %21 = memref.load %arg1[%20, %c5] : memref<2x8xi32, #tpu.memory_space<smem>>
    %22 = arith.index_cast %21 : i32 to index
    %c0_5 = arith.constant 0 : index
    %23 = vector.load %arg2[%22, %c0_5] : memref<65x32xf32, #tpu.memory_space<vmem>>, vector<1x32xf32>
    %24 = arith.index_cast %arg0 : i32 to index
    %c6 = arith.constant 6 : index
    %25 = memref.load %arg1[%24, %c6] : memref<2x8xi32, #tpu.memory_space<smem>>
    %26 = arith.index_cast %25 : i32 to index
    %c0_6 = arith.constant 0 : index
    %27 = vector.load %arg2[%26, %c0_6] : memref<65x32xf32, #tpu.memory_space<vmem>>, vector<1x32xf32>
    %28 = arith.index_cast %arg0 : i32 to index
    %c7 = arith.constant 7 : index
    %29 = memref.load %arg1[%28, %c7] : memref<2x8xi32, #tpu.memory_space<smem>>
    %30 = arith.index_cast %29 : i32 to index
    %c0_7 = arith.constant 0 : index
    %31 = vector.load %arg2[%30, %c0_7] : memref<65x32xf32, #tpu.memory_space<vmem>>, vector<1x32xf32>
    %32 = tpu.concatenate %3, %7, %11, %15, %19, %23, %27, %31 in 0 : vector<1x32xf32>, vector<1x32xf32>, vector<1x32xf32>, vector<1x32xf32>, vector<1x32xf32>, vector<1x32xf32>, vector<1x32xf32>, vector<1x32xf32> -> vector<8x32xf32>
    %c0_8 = arith.constant 0 : index
    %c0_9 = arith.constant 0 : index
    %33 = vector.load %arg3[%c0_8, %c0_9] : memref<8x32xf32, #tpu.memory_space<vmem>>, vector<8x32xf32>
    %34 = arith.addf %32, %33 : vector<8x32xf32>
    %c0_10 = arith.constant 0 : index
    %c0_11 = arith.constant 0 : index
    %35 = vector.load %arg4[%c0_10, %c0_11] : memref<32x32xf32, #tpu.memory_space<vmem>>, vector<32x32xf32>
    %c0_12 = arith.constant 0 : index
    %c0_13 = arith.constant 0 : index
    %36 = vector.load %arg5[%c0_12, %c0_13] : memref<1x32xf32, #tpu.memory_space<vmem>>, vector<1x32xf32>
    %c0_14 = arith.constant 0 : index
    %c0_15 = arith.constant 0 : index
    %37 = vector.load %arg6[%c0_14, %c0_15] : memref<1x32xf32, #tpu.memory_space<vmem>>, vector<1x32xf32>
    %cst = arith.constant dense<0.000000e+00> : vector<8xf32>
    %38 = vector.multi_reduction <add>, %34, %cst [1] : vector<8x32xf32> to vector<8xf32>
    %39 = vector.shape_cast %38 : vector<8xf32> to vector<8x1xf32>
    %cst_16 = arith.constant 3.200000e+01 : f32
    %40 = vector.broadcast %cst_16 : f32 to vector<8x1xf32>
    %41 = arith.divf %39, %40 : vector<8x1xf32>
    %42 = vector.broadcast %41 : vector<8x1xf32> to vector<8x32xf32>
    %43 = arith.subf %34, %42 : vector<8x32xf32>
    %44 = arith.mulf %43, %43 : vector<8x32xf32>
    %cst_17 = arith.constant dense<0.000000e+00> : vector<8xf32>
    %45 = vector.multi_reduction <add>, %44, %cst_17 [1] : vector<8x32xf32> to vector<8xf32>
    %46 = vector.shape_cast %45 : vector<8xf32> to vector<8x1xf32>
    %cst_18 = arith.constant 3.200000e+01 : f32
    %47 = vector.broadcast %cst_18 : f32 to vector<8x1xf32>
    %48 = arith.divf %46, %47 : vector<8x1xf32>
    %49 = vector.broadcast %41 : vector<8x1xf32> to vector<8x32xf32>
    %50 = arith.subf %34, %49 : vector<8x32xf32>
    %cst_19 = arith.constant 9.99999974E-6 : f32
    %51 = vector.broadcast %cst_19 : f32 to vector<8x1xf32>
    %52 = arith.addf %48, %51 : vector<8x1xf32>
    %53 = math.rsqrt %52 : vector<8x1xf32>
    %54 = vector.broadcast %53 : vector<8x1xf32> to vector<8x32xf32>
    %55 = arith.mulf %50, %54 : vector<8x32xf32>
    %56 = vector.broadcast %36 : vector<1x32xf32> to vector<8x32xf32>
    %57 = arith.mulf %55, %56 : vector<8x32xf32>
    %58 = vector.broadcast %37 : vector<1x32xf32> to vector<8x32xf32>
    %59 = arith.addf %57, %58 : vector<8x32xf32>
    %c0_20 = arith.constant 0 : index
    %c0_21 = arith.constant 0 : index
    %60 = vector.load %arg7[%c0_20, %c0_21] : memref<32x96xf32, #tpu.memory_space<vmem>>, vector<32x96xf32>
    %cst_22 = arith.constant dense<0.000000e+00> : vector<8x96xf32>
    %61 = tpu.matmul %59, %60, %cst_22 {dimension_numbers = #tpu.dot_dimension_numbers<[1], [0], [0], [1], [0, 0, 1, 1], [], []>} : vector<8x32xf32>, vector<32x96xf32>, vector<8x96xf32> -> vector<8x96xf32>
    %62 = vector.extract_strided_slice %61 {offsets = [0, 0], sizes = [8, 8], strides = [1, 1]} : vector<8x96xf32> to vector<8x8xf32>
    %63 = vector.extract_strided_slice %61 {offsets = [0, 8], sizes = [8, 8], strides = [1, 1]} : vector<8x96xf32> to vector<8x8xf32>
    %64 = vector.extract_strided_slice %61 {offsets = [0, 16], sizes = [8, 8], strides = [1, 1]} : vector<8x96xf32> to vector<8x8xf32>
    %65 = vector.extract_strided_slice %61 {offsets = [0, 24], sizes = [8, 8], strides = [1, 1]} : vector<8x96xf32> to vector<8x8xf32>
    %66 = tpu.concatenate %62, %63, %64, %65 in 0 : vector<8x8xf32>, vector<8x8xf32>, vector<8x8xf32>, vector<8x8xf32> -> vector<32x8xf32>
    %cst_23 = arith.constant 0.176776692 : f32
    %67 = vector.broadcast %cst_23 : f32 to vector<32x8xf32>
    %68 = arith.mulf %66, %67 : vector<32x8xf32>
    %69 = vector.extract_strided_slice %61 {offsets = [0, 32], sizes = [8, 8], strides = [1, 1]} : vector<8x96xf32> to vector<8x8xf32>
    %70 = vector.extract_strided_slice %61 {offsets = [0, 40], sizes = [8, 8], strides = [1, 1]} : vector<8x96xf32> to vector<8x8xf32>
    %71 = vector.extract_strided_slice %61 {offsets = [0, 48], sizes = [8, 8], strides = [1, 1]} : vector<8x96xf32> to vector<8x8xf32>
    %72 = vector.extract_strided_slice %61 {offsets = [0, 56], sizes = [8, 8], strides = [1, 1]} : vector<8x96xf32> to vector<8x8xf32>
    %73 = tpu.concatenate %69, %70, %71, %72 in 0 : vector<8x8xf32>, vector<8x8xf32>, vector<8x8xf32>, vector<8x8xf32> -> vector<32x8xf32>
    %74 = vector.extract_strided_slice %61 {offsets = [0, 64], sizes = [8, 8], strides = [1, 1]} : vector<8x96xf32> to vector<8x8xf32>
    %75 = vector.extract_strided_slice %61 {offsets = [0, 72], sizes = [8, 8], strides = [1, 1]} : vector<8x96xf32> to vector<8x8xf32>
    %76 = vector.extract_strided_slice %61 {offsets = [0, 80], sizes = [8, 8], strides = [1, 1]} : vector<8x96xf32> to vector<8x8xf32>
    %77 = vector.extract_strided_slice %61 {offsets = [0, 88], sizes = [8, 8], strides = [1, 1]} : vector<8x96xf32> to vector<8x8xf32>
    %78 = tpu.concatenate %74, %75, %76, %77 in 0 : vector<8x8xf32>, vector<8x8xf32>, vector<8x8xf32>, vector<8x8xf32> -> vector<32x8xf32>
    "tpu.trace_start"() <{level = 10 : i32, message = "td,sd->ts"}> : () -> ()
    %cst_24 = arith.constant dense<0.000000e+00> : vector<32x32xf32>
    %79 = tpu.matmul %68, %73, %cst_24 {dimension_numbers = #tpu.dot_dimension_numbers<[1], [1], [0], [0], [0, 0, 1, 0], [], []>} : vector<32x8xf32>, vector<32x8xf32>, vector<32x32xf32> -> vector<32x32xf32>
    "tpu.trace_stop"() : () -> ()
    %80 = arith.addf %79, %35 : vector<32x32xf32>
    %cst_25 = arith.constant dense<0xFF800000> : vector<32xf32>
    %81 = vector.multi_reduction <maximumf>, %80, %cst_25 [1] : vector<32x32xf32> to vector<32xf32>
    %82 = vector.shape_cast %81 : vector<32xf32> to vector<32x1xf32>
    %83 = vector.broadcast %82 : vector<32x1xf32> to vector<32x32xf32>
    %84 = arith.subf %80, %83 : vector<32x32xf32>
    %85 = math.exp %84 : vector<32x32xf32>
    %cst_26 = arith.constant dense<0.000000e+00> : vector<32xf32>
    %86 = vector.multi_reduction <add>, %85, %cst_26 [1] : vector<32x32xf32> to vector<32xf32>
    %87 = vector.shape_cast %86 : vector<32xf32> to vector<32x1xf32>
    %cst_27 = arith.constant dense<0.000000e+00> : vector<32x8xf32>
    %88 = tpu.matmul %85, %78, %cst_27 {dimension_numbers = #tpu.dot_dimension_numbers<[1], [0], [0], [1], [0, 0, 1, 1], [], []>} : vector<32x32xf32>, vector<32x8xf32>, vector<32x8xf32> -> vector<32x8xf32>
    %89 = tpu.reciprocal %87 {approx = true} : vector<32x1xf32> -> vector<32x1xf32>
    %90 = vector.broadcast %89 : vector<32x1xf32> to vector<32x8xf32>
    %91 = arith.mulf %88, %90 : vector<32x8xf32>
    %92 = vector.extract_strided_slice %91 {offsets = [0, 0], sizes = [8, 8], strides = [1, 1]} : vector<32x8xf32> to vector<8x8xf32>
    %93 = vector.extract_strided_slice %91 {offsets = [8, 0], sizes = [8, 8], strides = [1, 1]} : vector<32x8xf32> to vector<8x8xf32>
    %94 = vector.extract_strided_slice %91 {offsets = [16, 0], sizes = [8, 8], strides = [1, 1]} : vector<32x8xf32> to vector<8x8xf32>
    %95 = vector.extract_strided_slice %91 {offsets = [24, 0], sizes = [8, 8], strides = [1, 1]} : vector<32x8xf32> to vector<8x8xf32>
    %96 = tpu.concatenate %92, %93, %94, %95 in 1 : vector<8x8xf32>, vector<8x8xf32>, vector<8x8xf32>, vector<8x8xf32> -> vector<8x32xf32>
    %c0_28 = arith.constant 0 : index
    %c0_29 = arith.constant 0 : index
    %97 = vector.load %arg8[%c0_28, %c0_29] : memref<32x32xf32, #tpu.memory_space<vmem>>, vector<32x32xf32>
    %cst_30 = arith.constant dense<0.000000e+00> : vector<8x32xf32>
    %98 = tpu.matmul %96, %97, %cst_30 {dimension_numbers = #tpu.dot_dimension_numbers<[1], [0], [0], [1], [0, 0, 1, 1], [], []>} : vector<8x32xf32>, vector<32x32xf32>, vector<8x32xf32> -> vector<8x32xf32>
    %c0_31 = arith.constant 0 : index
    %c0_32 = arith.constant 0 : index
    %99 = vector.load %arg9[%c0_31, %c0_32] : memref<1x32xf32, #tpu.memory_space<vmem>>, vector<1x32xf32>
    %100 = vector.broadcast %99 : vector<1x32xf32> to vector<8x32xf32>
    %101 = arith.addf %98, %100 : vector<8x32xf32>
    %102 = arith.addf %34, %101 : vector<8x32xf32>
    %c0_33 = arith.constant 0 : index
    %c0_34 = arith.constant 0 : index
    %103 = vector.load %arg10[%c0_33, %c0_34] : memref<1x32xf32, #tpu.memory_space<vmem>>, vector<1x32xf32>
    %c0_35 = arith.constant 0 : index
    %c0_36 = arith.constant 0 : index
    %104 = vector.load %arg11[%c0_35, %c0_36] : memref<1x32xf32, #tpu.memory_space<vmem>>, vector<1x32xf32>
    %cst_37 = arith.constant dense<0.000000e+00> : vector<8xf32>
    %105 = vector.multi_reduction <add>, %102, %cst_37 [1] : vector<8x32xf32> to vector<8xf32>
    %106 = vector.shape_cast %105 : vector<8xf32> to vector<8x1xf32>
    %cst_38 = arith.constant 3.200000e+01 : f32
    %107 = vector.broadcast %cst_38 : f32 to vector<8x1xf32>
    %108 = arith.divf %106, %107 : vector<8x1xf32>
    %109 = vector.broadcast %108 : vector<8x1xf32> to vector<8x32xf32>
    %110 = arith.subf %102, %109 : vector<8x32xf32>
    %111 = arith.mulf %110, %110 : vector<8x32xf32>
    %cst_39 = arith.constant dense<0.000000e+00> : vector<8xf32>
    %112 = vector.multi_reduction <add>, %111, %cst_39 [1] : vector<8x32xf32> to vector<8xf32>
    %113 = vector.shape_cast %112 : vector<8xf32> to vector<8x1xf32>
    %cst_40 = arith.constant 3.200000e+01 : f32
    %114 = vector.broadcast %cst_40 : f32 to vector<8x1xf32>
    %115 = arith.divf %113, %114 : vector<8x1xf32>
    %116 = vector.broadcast %108 : vector<8x1xf32> to vector<8x32xf32>
    %117 = arith.subf %102, %116 : vector<8x32xf32>
    %cst_41 = arith.constant 9.99999974E-6 : f32
    %118 = vector.broadcast %cst_41 : f32 to vector<8x1xf32>
    %119 = arith.addf %115, %118 : vector<8x1xf32>
    %120 = math.rsqrt %119 : vector<8x1xf32>
    %121 = vector.broadcast %120 : vector<8x1xf32> to vector<8x32xf32>
    %122 = arith.mulf %117, %121 : vector<8x32xf32>
    %123 = vector.broadcast %103 : vector<1x32xf32> to vector<8x32xf32>
    %124 = arith.mulf %122, %123 : vector<8x32xf32>
    %125 = vector.broadcast %104 : vector<1x32xf32> to vector<8x32xf32>
    %126 = arith.addf %124, %125 : vector<8x32xf32>
    %c0_42 = arith.constant 0 : index
    %c0_43 = arith.constant 0 : index
    %127 = vector.load %arg12[%c0_42, %c0_43] : memref<32x128xf32, #tpu.memory_space<vmem>>, vector<32x128xf32>
    %cst_44 = arith.constant dense<0.000000e+00> : vector<8x128xf32>
    %128 = tpu.matmul %126, %127, %cst_44 {dimension_numbers = #tpu.dot_dimension_numbers<[1], [0], [0], [1], [0, 0, 1, 1], [], []>} : vector<8x32xf32>, vector<32x128xf32>, vector<8x128xf32> -> vector<8x128xf32>
    %c0_45 = arith.constant 0 : index
    %c0_46 = arith.constant 0 : index
    %129 = vector.load %arg13[%c0_45, %c0_46] : memref<1x128xf32, #tpu.memory_space<vmem>>, vector<1x128xf32>
    %130 = vector.broadcast %129 : vector<1x128xf32> to vector<8x128xf32>
    %131 = arith.addf %128, %130 : vector<8x128xf32>
    %cst_47 = arith.constant 0.000000e+00 : f32
    %132 = vector.broadcast %cst_47 : f32 to vector<8x128xf32>
    %133 = arith.maximumf %131, %132 : vector<8x128xf32>
    %c0_48 = arith.constant 0 : index
    %c0_49 = arith.constant 0 : index
    %134 = vector.load %arg14[%c0_48, %c0_49] : memref<128x32xf32, #tpu.memory_space<vmem>>, vector<128x32xf32>
    %cst_50 = arith.constant dense<0.000000e+00> : vector<8x32xf32>
    %135 = tpu.matmul %133, %134, %cst_50 {dimension_numbers = #tpu.dot_dimension_numbers<[1], [0], [0], [1], [0, 0, 1, 1], [], []>} : vector<8x128xf32>, vector<128x32xf32>, vector<8x32xf32> -> vector<8x32xf32>
    %c0_51 = arith.constant 0 : index
    %c0_52 = arith.constant 0 : index
    %136 = vector.load %arg15[%c0_51, %c0_52] : memref<1x32xf32, #tpu.memory_space<vmem>>, vector<1x32xf32>
    %137 = vector.broadcast %136 : vector<1x32xf32> to vector<8x32xf32>
    %138 = arith.addf %135, %137 : vector<8x32xf32>
    %139 = arith.addf %102, %138 : vector<8x32xf32>
    %c0_53 = arith.constant 0 : index
    %c0_54 = arith.constant 0 : index
    %140 = vector.load %arg16[%c0_53, %c0_54] : memref<1x32xf32, #tpu.memory_space<vmem>>, vector<1x32xf32>
    %c0_55 = arith.constant 0 : index
    %c0_56 = arith.constant 0 : index
    %141 = vector.load %arg17[%c0_55, %c0_56] : memref<1x32xf32, #tpu.memory_space<vmem>>, vector<1x32xf32>
    %cst_57 = arith.constant dense<0.000000e+00> : vector<8xf32>
    %142 = vector.multi_reduction <add>, %139, %cst_57 [1] : vector<8x32xf32> to vector<8xf32>
    %143 = vector.shape_cast %142 : vector<8xf32> to vector<8x1xf32>
    %cst_58 = arith.constant 3.200000e+01 : f32
    %144 = vector.broadcast %cst_58 : f32 to vector<8x1xf32>
    %145 = arith.divf %143, %144 : vector<8x1xf32>
    %146 = vector.broadcast %145 : vector<8x1xf32> to vector<8x32xf32>
    %147 = arith.subf %139, %146 : vector<8x32xf32>
    %148 = arith.mulf %147, %147 : vector<8x32xf32>
    %cst_59 = arith.constant dense<0.000000e+00> : vector<8xf32>
    %149 = vector.multi_reduction <add>, %148, %cst_59 [1] : vector<8x32xf32> to vector<8xf32>
    %150 = vector.shape_cast %149 : vector<8xf32> to vector<8x1xf32>
    %cst_60 = arith.constant 3.200000e+01 : f32
    %151 = vector.broadcast %cst_60 : f32 to vector<8x1xf32>
    %152 = arith.divf %150, %151 : vector<8x1xf32>
    %153 = vector.broadcast %145 : vector<8x1xf32> to vector<8x32xf32>
    %154 = arith.subf %139, %153 : vector<8x32xf32>
    %cst_61 = arith.constant 9.99999974E-6 : f32
    %155 = vector.broadcast %cst_61 : f32 to vector<8x1xf32>
    %156 = arith.addf %152, %155 : vector<8x1xf32>
    %157 = math.rsqrt %156 : vector<8x1xf32>
    %158 = vector.broadcast %157 : vector<8x1xf32> to vector<8x32xf32>
    %159 = arith.mulf %154, %158 : vector<8x32xf32>
    %160 = vector.broadcast %140 : vector<1x32xf32> to vector<8x32xf32>
    %161 = arith.mulf %159, %160 : vector<8x32xf32>
    %162 = vector.broadcast %141 : vector<1x32xf32> to vector<8x32xf32>
    %163 = arith.addf %161, %162 : vector<8x32xf32>
    %c0_62 = arith.constant 0 : index
    %c0_63 = arith.constant 0 : index
    %164 = vector.load %arg18[%c0_62, %c0_63] : memref<32x96xf32, #tpu.memory_space<vmem>>, vector<32x96xf32>
    %cst_64 = arith.constant dense<0.000000e+00> : vector<8x96xf32>
    %165 = tpu.matmul %163, %164, %cst_64 {dimension_numbers = #tpu.dot_dimension_numbers<[1], [0], [0], [1], [0, 0, 1, 1], [], []>} : vector<8x32xf32>, vector<32x96xf32>, vector<8x96xf32> -> vector<8x96xf32>
    %166 = vector.extract_strided_slice %165 {offsets = [0, 0], sizes = [8, 8], strides = [1, 1]} : vector<8x96xf32> to vector<8x8xf32>
    %167 = vector.extract_strided_slice %165 {offsets = [0, 8], sizes = [8, 8], strides = [1, 1]} : vector<8x96xf32> to vector<8x8xf32>
    %168 = vector.extract_strided_slice %165 {offsets = [0, 16], sizes = [8, 8], strides = [1, 1]} : vector<8x96xf32> to vector<8x8xf32>
    %169 = vector.extract_strided_slice %165 {offsets = [0, 24], sizes = [8, 8], strides = [1, 1]} : vector<8x96xf32> to vector<8x8xf32>
    %170 = tpu.concatenate %166, %167, %168, %169 in 0 : vector<8x8xf32>, vector<8x8xf32>, vector<8x8xf32>, vector<8x8xf32> -> vector<32x8xf32>
    %cst_65 = arith.constant 0.176776692 : f32
    %171 = vector.broadcast %cst_65 : f32 to vector<32x8xf32>
    %172 = arith.mulf %170, %171 : vector<32x8xf32>
    %173 = vector.extract_strided_slice %165 {offsets = [0, 32], sizes = [8, 8], strides = [1, 1]} : vector<8x96xf32> to vector<8x8xf32>
    %174 = vector.extract_strided_slice %165 {offsets = [0, 40], sizes = [8, 8], strides = [1, 1]} : vector<8x96xf32> to vector<8x8xf32>
    %175 = vector.extract_strided_slice %165 {offsets = [0, 48], sizes = [8, 8], strides = [1, 1]} : vector<8x96xf32> to vector<8x8xf32>
    %176 = vector.extract_strided_slice %165 {offsets = [0, 56], sizes = [8, 8], strides = [1, 1]} : vector<8x96xf32> to vector<8x8xf32>
    %177 = tpu.concatenate %173, %174, %175, %176 in 0 : vector<8x8xf32>, vector<8x8xf32>, vector<8x8xf32>, vector<8x8xf32> -> vector<32x8xf32>
    %178 = vector.extract_strided_slice %165 {offsets = [0, 64], sizes = [8, 8], strides = [1, 1]} : vector<8x96xf32> to vector<8x8xf32>
    %179 = vector.extract_strided_slice %165 {offsets = [0, 72], sizes = [8, 8], strides = [1, 1]} : vector<8x96xf32> to vector<8x8xf32>
    %180 = vector.extract_strided_slice %165 {offsets = [0, 80], sizes = [8, 8], strides = [1, 1]} : vector<8x96xf32> to vector<8x8xf32>
    %181 = vector.extract_strided_slice %165 {offsets = [0, 88], sizes = [8, 8], strides = [1, 1]} : vector<8x96xf32> to vector<8x8xf32>
    %182 = tpu.concatenate %178, %179, %180, %181 in 0 : vector<8x8xf32>, vector<8x8xf32>, vector<8x8xf32>, vector<8x8xf32> -> vector<32x8xf32>
    "tpu.trace_start"() <{level = 10 : i32, message = "td,sd->ts"}> : () -> ()
    %cst_66 = arith.constant dense<0.000000e+00> : vector<32x32xf32>
    %183 = tpu.matmul %172, %177, %cst_66 {dimension_numbers = #tpu.dot_dimension_numbers<[1], [1], [0], [0], [0, 0, 1, 0], [], []>} : vector<32x8xf32>, vector<32x8xf32>, vector<32x32xf32> -> vector<32x32xf32>
    "tpu.trace_stop"() : () -> ()
    %184 = arith.addf %183, %35 : vector<32x32xf32>
    %cst_67 = arith.constant dense<0xFF800000> : vector<32xf32>
    %185 = vector.multi_reduction <maximumf>, %184, %cst_67 [1] : vector<32x32xf32> to vector<32xf32>
    %186 = vector.shape_cast %185 : vector<32xf32> to vector<32x1xf32>
    %187 = vector.broadcast %186 : vector<32x1xf32> to vector<32x32xf32>
    %188 = arith.subf %184, %187 : vector<32x32xf32>
    %189 = math.exp %188 : vector<32x32xf32>
    %cst_68 = arith.constant dense<0.000000e+00> : vector<32xf32>
    %190 = vector.multi_reduction <add>, %189, %cst_68 [1] : vector<32x32xf32> to vector<32xf32>
    %191 = vector.shape_cast %190 : vector<32xf32> to vector<32x1xf32>
    %cst_69 = arith.constant dense<0.000000e+00> : vector<32x8xf32>
    %192 = tpu.matmul %189, %182, %cst_69 {dimension_numbers = #tpu.dot_dimension_numbers<[1], [0], [0], [1], [0, 0, 1, 1], [], []>} : vector<32x32xf32>, vector<32x8xf32>, vector<32x8xf32> -> vector<32x8xf32>
    %193 = tpu.reciprocal %191 {approx = true} : vector<32x1xf32> -> vector<32x1xf32>
    %194 = vector.broadcast %193 : vector<32x1xf32> to vector<32x8xf32>
    %195 = arith.mulf %192, %194 : vector<32x8xf32>
    %196 = vector.extract_strided_slice %195 {offsets = [0, 0], sizes = [8, 8], strides = [1, 1]} : vector<32x8xf32> to vector<8x8xf32>
    %197 = vector.extract_strided_slice %195 {offsets = [8, 0], sizes = [8, 8], strides = [1, 1]} : vector<32x8xf32> to vector<8x8xf32>
    %198 = vector.extract_strided_slice %195 {offsets = [16, 0], sizes = [8, 8], strides = [1, 1]} : vector<32x8xf32> to vector<8x8xf32>
    %199 = vector.extract_strided_slice %195 {offsets = [24, 0], sizes = [8, 8], strides = [1, 1]} : vector<32x8xf32> to vector<8x8xf32>
    %200 = tpu.concatenate %196, %197, %198, %199 in 1 : vector<8x8xf32>, vector<8x8xf32>, vector<8x8xf32>, vector<8x8xf32> -> vector<8x32xf32>
    %c0_70 = arith.constant 0 : index
    %c0_71 = arith.constant 0 : index
    %201 = vector.load %arg19[%c0_70, %c0_71] : memref<32x32xf32, #tpu.memory_space<vmem>>, vector<32x32xf32>
    %cst_72 = arith.constant dense<0.000000e+00> : vector<8x32xf32>
    %202 = tpu.matmul %200, %201, %cst_72 {dimension_numbers = #tpu.dot_dimension_numbers<[1], [0], [0], [1], [0, 0, 1, 1], [], []>} : vector<8x32xf32>, vector<32x32xf32>, vector<8x32xf32> -> vector<8x32xf32>
    %c0_73 = arith.constant 0 : index
    %c0_74 = arith.constant 0 : index
    %203 = vector.load %arg20[%c0_73, %c0_74] : memref<1x32xf32, #tpu.memory_space<vmem>>, vector<1x32xf32>
    %204 = vector.broadcast %203 : vector<1x32xf32> to vector<8x32xf32>
    %205 = arith.addf %202, %204 : vector<8x32xf32>
    %206 = arith.addf %139, %205 : vector<8x32xf32>
    %c0_75 = arith.constant 0 : index
    %c0_76 = arith.constant 0 : index
    %207 = vector.load %arg21[%c0_75, %c0_76] : memref<1x32xf32, #tpu.memory_space<vmem>>, vector<1x32xf32>
    %c0_77 = arith.constant 0 : index
    %c0_78 = arith.constant 0 : index
    %208 = vector.load %arg22[%c0_77, %c0_78] : memref<1x32xf32, #tpu.memory_space<vmem>>, vector<1x32xf32>
    %cst_79 = arith.constant dense<0.000000e+00> : vector<8xf32>
    %209 = vector.multi_reduction <add>, %206, %cst_79 [1] : vector<8x32xf32> to vector<8xf32>
    %210 = vector.shape_cast %209 : vector<8xf32> to vector<8x1xf32>
    %cst_80 = arith.constant 3.200000e+01 : f32
    %211 = vector.broadcast %cst_80 : f32 to vector<8x1xf32>
    %212 = arith.divf %210, %211 : vector<8x1xf32>
    %213 = vector.broadcast %212 : vector<8x1xf32> to vector<8x32xf32>
    %214 = arith.subf %206, %213 : vector<8x32xf32>
    %215 = arith.mulf %214, %214 : vector<8x32xf32>
    %cst_81 = arith.constant dense<0.000000e+00> : vector<8xf32>
    %216 = vector.multi_reduction <add>, %215, %cst_81 [1] : vector<8x32xf32> to vector<8xf32>
    %217 = vector.shape_cast %216 : vector<8xf32> to vector<8x1xf32>
    %cst_82 = arith.constant 3.200000e+01 : f32
    %218 = vector.broadcast %cst_82 : f32 to vector<8x1xf32>
    %219 = arith.divf %217, %218 : vector<8x1xf32>
    %220 = vector.broadcast %212 : vector<8x1xf32> to vector<8x32xf32>
    %221 = arith.subf %206, %220 : vector<8x32xf32>
    %cst_83 = arith.constant 9.99999974E-6 : f32
    %222 = vector.broadcast %cst_83 : f32 to vector<8x1xf32>
    %223 = arith.addf %219, %222 : vector<8x1xf32>
    %224 = math.rsqrt %223 : vector<8x1xf32>
    %225 = vector.broadcast %224 : vector<8x1xf32> to vector<8x32xf32>
    %226 = arith.mulf %221, %225 : vector<8x32xf32>
    %227 = vector.broadcast %207 : vector<1x32xf32> to vector<8x32xf32>
    %228 = arith.mulf %226, %227 : vector<8x32xf32>
    %229 = vector.broadcast %208 : vector<1x32xf32> to vector<8x32xf32>
    %230 = arith.addf %228, %229 : vector<8x32xf32>
    %c0_84 = arith.constant 0 : index
    %c0_85 = arith.constant 0 : index
    %231 = vector.load %arg23[%c0_84, %c0_85] : memref<32x128xf32, #tpu.memory_space<vmem>>, vector<32x128xf32>
    %cst_86 = arith.constant dense<0.000000e+00> : vector<8x128xf32>
    %232 = tpu.matmul %230, %231, %cst_86 {dimension_numbers = #tpu.dot_dimension_numbers<[1], [0], [0], [1], [0, 0, 1, 1], [], []>} : vector<8x32xf32>, vector<32x128xf32>, vector<8x128xf32> -> vector<8x128xf32>
    %c0_87 = arith.constant 0 : index
    %c0_88 = arith.constant 0 : index
    %233 = vector.load %arg24[%c0_87, %c0_88] : memref<1x128xf32, #tpu.memory_space<vmem>>, vector<1x128xf32>
    %234 = vector.broadcast %233 : vector<1x128xf32> to vector<8x128xf32>
    %235 = arith.addf %232, %234 : vector<8x128xf32>
    %cst_89 = arith.constant 0.000000e+00 : f32
    %236 = vector.broadcast %cst_89 : f32 to vector<8x128xf32>
    %237 = arith.maximumf %235, %236 : vector<8x128xf32>
    %c0_90 = arith.constant 0 : index
    %c0_91 = arith.constant 0 : index
    %238 = vector.load %arg25[%c0_90, %c0_91] : memref<128x32xf32, #tpu.memory_space<vmem>>, vector<128x32xf32>
    %cst_92 = arith.constant dense<0.000000e+00> : vector<8x32xf32>
    %239 = tpu.matmul %237, %238, %cst_92 {dimension_numbers = #tpu.dot_dimension_numbers<[1], [0], [0], [1], [0, 0, 1, 1], [], []>} : vector<8x128xf32>, vector<128x32xf32>, vector<8x32xf32> -> vector<8x32xf32>
    %c0_93 = arith.constant 0 : index
    %c0_94 = arith.constant 0 : index
    %240 = vector.load %arg26[%c0_93, %c0_94] : memref<1x32xf32, #tpu.memory_space<vmem>>, vector<1x32xf32>
    %241 = vector.broadcast %240 : vector<1x32xf32> to vector<8x32xf32>
    %242 = arith.addf %239, %241 : vector<8x32xf32>
    %243 = arith.addf %206, %242 : vector<8x32xf32>
    %c0_95 = arith.constant 0 : index
    %c0_96 = arith.constant 0 : index
    %244 = vector.load %arg27[%c0_95, %c0_96] : memref<1x32xf32, #tpu.memory_space<vmem>>, vector<1x32xf32>
    %c0_97 = arith.constant 0 : index
    %c0_98 = arith.constant 0 : index
    %245 = vector.load %arg28[%c0_97, %c0_98] : memref<1x32xf32, #tpu.memory_space<vmem>>, vector<1x32xf32>
    %cst_99 = arith.constant dense<0.000000e+00> : vector<8xf32>
    %246 = vector.multi_reduction <add>, %243, %cst_99 [1] : vector<8x32xf32> to vector<8xf32>
    %247 = vector.shape_cast %246 : vector<8xf32> to vector<8x1xf32>
    %cst_100 = arith.constant 3.200000e+01 : f32
    %248 = vector.broadcast %cst_100 : f32 to vector<8x1xf32>
    %249 = arith.divf %247, %248 : vector<8x1xf32>
    %250 = vector.broadcast %249 : vector<8x1xf32> to vector<8x32xf32>
    %251 = arith.subf %243, %250 : vector<8x32xf32>
    %252 = arith.mulf %251, %251 : vector<8x32xf32>
    %cst_101 = arith.constant dense<0.000000e+00> : vector<8xf32>
    %253 = vector.multi_reduction <add>, %252, %cst_101 [1] : vector<8x32xf32> to vector<8xf32>
    %254 = vector.shape_cast %253 : vector<8xf32> to vector<8x1xf32>
    %cst_102 = arith.constant 3.200000e+01 : f32
    %255 = vector.broadcast %cst_102 : f32 to vector<8x1xf32>
    %256 = arith.divf %254, %255 : vector<8x1xf32>
    %257 = vector.broadcast %249 : vector<8x1xf32> to vector<8x32xf32>
    %258 = arith.subf %243, %257 : vector<8x32xf32>
    %cst_103 = arith.constant 9.99999974E-6 : f32
    %259 = vector.broadcast %cst_103 : f32 to vector<8x1xf32>
    %260 = arith.addf %256, %259 : vector<8x1xf32>
    %261 = math.rsqrt %260 : vector<8x1xf32>
    %262 = vector.broadcast %261 : vector<8x1xf32> to vector<8x32xf32>
    %263 = arith.mulf %258, %262 : vector<8x32xf32>
    %264 = vector.broadcast %244 : vector<1x32xf32> to vector<8x32xf32>
    %265 = arith.mulf %263, %264 : vector<8x32xf32>
    %266 = vector.broadcast %245 : vector<1x32xf32> to vector<8x32xf32>
    %267 = arith.addf %265, %266 : vector<8x32xf32>
    %c0_104 = arith.constant 0 : index
    %c0_105 = arith.constant 0 : index
    %268 = vector.load %arg29[%c0_104, %c0_105] : memref<32x128xf32, #tpu.memory_space<vmem>>, vector<32x128xf32>
    %cst_106 = arith.constant dense<0.000000e+00> : vector<8x128xf32>
    %269 = tpu.matmul %267, %268, %cst_106 {dimension_numbers = #tpu.dot_dimension_numbers<[1], [0], [0], [1], [0, 0, 1, 1], [], []>} : vector<8x32xf32>, vector<32x128xf32>, vector<8x128xf32> -> vector<8x128xf32>
    %c0_107 = arith.constant 0 : index
    %c0_108 = arith.constant 0 : index
    %270 = vector.load %arg30[%c0_107, %c0_108] : memref<1x128xf32, #tpu.memory_space<vmem>>, vector<1x128xf32>
    %271 = vector.broadcast %270 : vector<1x128xf32> to vector<8x128xf32>
    %272 = arith.addf %269, %271 : vector<8x128xf32>
    %c0_109 = arith.constant 0 : index
    %c0_110 = arith.constant 0 : index
    %c0_111 = arith.constant 0 : index
    %273 = vector.load %arg31[%c0_109, %c0_110, %c0_111] : memref<1x8x128xf32, #tpu.memory_space<vmem>>, vector<1x8x128xf32>
    %274 = vector.shape_cast %273 : vector<1x8x128xf32> to vector<8x128xf32>
    %275 = vector.shape_cast %272 : vector<8x128xf32> to vector<1x8x128xf32>
    tpu.vector_store %arg31[%c0_109, %c0_110, %c0_111], %275 {strides = array<i32>} : memref<1x8x128xf32, #tpu.memory_space<vmem>>, vector<1x8x128xf32>,
    return
  }
  func.func @transform_0(%arg0: i32, %arg1: memref<2x8xi32, #tpu.memory_space<smem>>) -> (i32, i32) {
    %c0_i32 = arith.constant 0 : i32
    %c0_i32_0 = arith.constant 0 : i32
    %c0_i32_1 = arith.constant 0 : i32
    return %c0_i32, %c0_i32_0 : i32, i32
  }
  func.func @transform_1(%arg0: i32, %arg1: memref<2x8xi32, #tpu.memory_space<smem>>) -> (i32, i32) {
    %c0_i32 = arith.constant 0 : i32
    %c0_i32_0 = arith.constant 0 : i32
    %c0_i32_1 = arith.constant 0 : i32
    return %c0_i32, %c0_i32_0 : i32, i32
  }
  func.func @transform_2(%arg0: i32, %arg1: memref<2x8xi32, #tpu.memory_space<smem>>) -> (i32, i32) {
    %c0_i32 = arith.constant 0 : i32
    %c0_i32_0 = arith.constant 0 : i32
    %c0_i32_1 = arith.constant 0 : i32
    return %c0_i32, %c0_i32_0 : i32, i32
  }
  func.func @transform_3(%arg0: i32, %arg1: memref<2x8xi32, #tpu.memory_space<smem>>) -> (i32, i32) {
    %c0_i32 = arith.constant 0 : i32
    %c0_i32_0 = arith.constant 0 : i32
    %c0_i32_1 = arith.constant 0 : i32
    return %c0_i32, %c0_i32_0 : i32, i32
  }
  func.func @transform_4(%arg0: i32, %arg1: memref<2x8xi32, #tpu.memory_space<smem>>) -> (i32, i32) {
    %c0_i32 = arith.constant 0 : i32
    %c0_i32_0 = arith.constant 0 : i32
    %c0_i32_1 = arith.constant 0 : i32
    return %c0_i32, %c0_i32_0 : i32, i32
  }
  func.func @transform_5(%arg0: i32, %arg1: memref<2x8xi32, #tpu.memory_space<smem>>) -> (i32, i32) {
    %c0_i32 = arith.constant 0 : i32
    %c0_i32_0 = arith.constant 0 : i32
    %c0_i32_1 = arith.constant 0 : i32
    return %c0_i32, %c0_i32_0 : i32, i32
  }
  func.func @transform_6(%arg0: i32, %arg1: memref<2x8xi32, #tpu.memory_space<smem>>) -> (i32, i32) {
    %c0_i32 = arith.constant 0 : i32
    %c0_i32_0 = arith.constant 0 : i32
    %c0_i32_1 = arith.constant 0 : i32
    return %c0_i32, %c0_i32_0 : i32, i32
  }
  func.func @transform_7(%arg0: i32, %arg1: memref<2x8xi32, #tpu.memory_space<smem>>) -> (i32, i32) {
    %c0_i32 = arith.constant 0 : i32
    %c0_i32_0 = arith.constant 0 : i32
    %c0_i32_1 = arith.constant 0 : i32
    return %c0_i32, %c0_i32_0 : i32, i32
  }
  func.func @transform_8(%arg0: i32, %arg1: memref<2x8xi32, #tpu.memory_space<smem>>) -> (i32, i32) {
    %c0_i32 = arith.constant 0 : i32
    %c0_i32_0 = arith.constant 0 : i32
    %c0_i32_1 = arith.constant 0 : i32
    return %c0_i32, %c0_i32_0 : i32, i32
  }
  func.func @transform_9(%arg0: i32, %arg1: memref<2x8xi32, #tpu.memory_space<smem>>) -> (i32, i32) {
    %c0_i32 = arith.constant 0 : i32
    %c0_i32_0 = arith.constant 0 : i32
    %c0_i32_1 = arith.constant 0 : i32
    return %c0_i32, %c0_i32_0 : i32, i32
  }
  func.func @transform_10(%arg0: i32, %arg1: memref<2x8xi32, #tpu.memory_space<smem>>) -> (i32, i32) {
    %c0_i32 = arith.constant 0 : i32
    %c0_i32_0 = arith.constant 0 : i32
    %c0_i32_1 = arith.constant 0 : i32
    return %c0_i32, %c0_i32_0 : i32, i32
  }
  func.func @transform_11(%arg0: i32, %arg1: memref<2x8xi32, #tpu.memory_space<smem>>) -> (i32, i32) {
    %c0_i32 = arith.constant 0 : i32
    %c0_i32_0 = arith.constant 0 : i32
    %c0_i32_1 = arith.constant 0 : i32
    return %c0_i32, %c0_i32_0 : i32, i32
  }
  func.func @transform_12(%arg0: i32, %arg1: memref<2x8xi32, #tpu.memory_space<smem>>) -> (i32, i32) {
    %c0_i32 = arith.constant 0 : i32
    %c0_i32_0 = arith.constant 0 : i32
    %c0_i32_1 = arith.constant 0 : i32
    return %c0_i32, %c0_i32_0 : i32, i32
  }
  func.func @transform_13(%arg0: i32, %arg1: memref<2x8xi32, #tpu.memory_space<smem>>) -> (i32, i32) {
    %c0_i32 = arith.constant 0 : i32
    %c0_i32_0 = arith.constant 0 : i32
    %c0_i32_1 = arith.constant 0 : i32
    return %c0_i32, %c0_i32_0 : i32, i32
  }
  func.func @transform_14(%arg0: i32, %arg1: memref<2x8xi32, #tpu.memory_space<smem>>) -> (i32, i32) {
    %c0_i32 = arith.constant 0 : i32
    %c0_i32_0 = arith.constant 0 : i32
    %c0_i32_1 = arith.constant 0 : i32
    return %c0_i32, %c0_i32_0 : i32, i32
  }
  func.func @transform_15(%arg0: i32, %arg1: memref<2x8xi32, #tpu.memory_space<smem>>) -> (i32, i32) {
    %c0_i32 = arith.constant 0 : i32
    %c0_i32_0 = arith.constant 0 : i32
    %c0_i32_1 = arith.constant 0 : i32
    return %c0_i32, %c0_i32_0 : i32, i32
  }
  func.func @transform_16(%arg0: i32, %arg1: memref<2x8xi32, #tpu.memory_space<smem>>) -> (i32, i32) {
    %c0_i32 = arith.constant 0 : i32
    %c0_i32_0 = arith.constant 0 : i32
    %c0_i32_1 = arith.constant 0 : i32
    return %c0_i32, %c0_i32_0 : i32, i32
  }
  func.func @transform_17(%arg0: i32, %arg1: memref<2x8xi32, #tpu.memory_space<smem>>) -> (i32, i32) {
    %c0_i32 = arith.constant 0 : i32
    %c0_i32_0 = arith.constant 0 : i32
    %c0_i32_1 = arith.constant 0 : i32
    return %c0_i32, %c0_i32_0 : i32, i32
  }
  func.func @transform_18(%arg0: i32, %arg1: memref<2x8xi32, #tpu.memory_space<smem>>) -> (i32, i32) {
    %c0_i32 = arith.constant 0 : i32
    %c0_i32_0 = arith.constant 0 : i32
    %c0_i32_1 = arith.constant 0 : i32
    return %c0_i32, %c0_i32_0 : i32, i32
  }
  func.func @transform_19(%arg0: i32, %arg1: memref<2x8xi32, #tpu.memory_space<smem>>) -> (i32, i32) {
    %c0_i32 = arith.constant 0 : i32
    %c0_i32_0 = arith.constant 0 : i32
    %c0_i32_1 = arith.constant 0 : i32
    return %c0_i32, %c0_i32_0 : i32, i32
  }
  func.func @transform_20(%arg0: i32, %arg1: memref<2x8xi32, #tpu.memory_space<smem>>) -> (i32, i32) {
    %c0_i32 = arith.constant 0 : i32
    %c0_i32_0 = arith.constant 0 : i32
    %c0_i32_1 = arith.constant 0 : i32
    return %c0_i32, %c0_i32_0 : i32, i32
  }
  func.func @transform_21(%arg0: i32, %arg1: memref<2x8xi32, #tpu.memory_space<smem>>) -> (i32, i32) {
    %c0_i32 = arith.constant 0 : i32
    %c0_i32_0 = arith.constant 0 : i32
    %c0_i32_1 = arith.constant 0 : i32
    return %c0_i32, %c0_i32_0 : i32, i32
  }
  func.func @transform_22(%arg0: i32, %arg1: memref<2x8xi32, #tpu.memory_space<smem>>) -> (i32, i32) {
    %c0_i32 = arith.constant 0 : i32
    %c0_i32_0 = arith.constant 0 : i32
    %c0_i32_1 = arith.constant 0 : i32
    return %c0_i32, %c0_i32_0 : i32, i32
  }
  func.func @transform_23(%arg0: i32, %arg1: memref<2x8xi32, #tpu.memory_space<smem>>) -> (i32, i32) {
    %c0_i32 = arith.constant 0 : i32
    %c0_i32_0 = arith.constant 0 : i32
    %c0_i32_1 = arith.constant 0 : i32
    return %c0_i32, %c0_i32_0 : i32, i32
  }
  func.func @transform_24(%arg0: i32, %arg1: memref<2x8xi32, #tpu.memory_space<smem>>) -> (i32, i32) {
    %c0_i32 = arith.constant 0 : i32
    %c0_i32_0 = arith.constant 0 : i32
    %c0_i32_1 = arith.constant 0 : i32
    return %c0_i32, %c0_i32_0 : i32, i32
  }
  func.func @transform_25(%arg0: i32, %arg1: memref<2x8xi32, #tpu.memory_space<smem>>) -> (i32, i32) {
    %c0_i32 = arith.constant 0 : i32
    %c0_i32_0 = arith.constant 0 : i32
    %c0_i32_1 = arith.constant 0 : i32
    return %c0_i32, %c0_i32_0 : i32, i32
  }
  func.func @transform_26(%arg0: i32, %arg1: memref<2x8xi32, #tpu.memory_space<smem>>) -> (i32, i32) {
    %c0_i32 = arith.constant 0 : i32
    %c0_i32_0 = arith.constant 0 : i32
    %c0_i32_1 = arith.constant 0 : i32
    return %c0_i32, %c0_i32_0 : i32, i32
  }
  func.func @transform_27(%arg0: i32, %arg1: memref<2x8xi32, #tpu.memory_space<smem>>) -> (i32, i32) {
    %c0_i32 = arith.constant 0 : i32
    %c0_i32_0 = arith.constant 0 : i32
    %c0_i32_1 = arith.constant 0 : i32
    return %c0_i32, %c0_i32_0 : i32, i32
  }
  func.func @transform_28(%arg0: i32, %arg1: memref<2x8xi32, #tpu.memory_space<smem>>) -> (i32, i32) {
    %c0_i32 = arith.constant 0 : i32
    %c0_i32_0 = arith.constant 0 : i32
    %c0_i32_1 = arith.constant 0 : i32
    return %c0_i32, %c0_i32_0 : i32, i32
  }
  func.func @transform_29(%arg0: i32, %arg1: memref<2x8xi32, #tpu.memory_space<smem>>) -> (i32, i32, i32) {
    %c0_i32 = arith.constant 0 : i32
    %c0_i32_0 = arith.constant 0 : i32
    %c0_i32_1 = arith.constant 0 : i32
    return %arg0, %c0_i32, %c0_i32_0 : i32, i32, i32
  }
}

</mosaic_0001>

<bundles_post_ra>
// kernel: tpu_custom_call.1
= control target key start
LH: loop header
LB: loop body
LE: loop exit
PB: predicated region body
PF: predicated region fallthrough
CT: control target
= control target key end

     0   :  { %s2176_s6 = smov 1   ;;  %s2177_s10 = smov 2   ;;  %s2679_s0 = inlined_call_operand.smem [shape: u32[31], index: -1, kind: input, shape index: {}] }
   0x1   :  { %s2224_s5 = sld [smem:[%s2679_s0]]   ;;  %s2178_s14 = smov 3  }
   0x2   :  { %s2229_s9 = sld [smem:[%s2679_s0 + %s2176_s6]]   ;;  %s2179_s18 = smov 4  }
   0x3   :  { %s2234_s13 = sld [smem:[%s2679_s0 + %s2177_s10]]   ;;  %s2180_s22 = smov 5  }
   0x4   :  { %s2239_s17 = sld [smem:[%s2679_s0 + %s2178_s14]]   ;;  %s2181_s26 = smov 6  }
   0x5   :  { %s2244_s21 = sld [smem:[%s2679_s0 + %s2179_s18]]   ;;  %s2182_s30 = smov 7  }
   0x6   :  { %s2249_s25 = sld [smem:[%s2679_s0 + %s2180_s22]]   ;;  %s2183_s4 = smov 8  }
   0x7   :  { %s2254_s29 = sld [smem:[%s2679_s0 + %s2181_s26]]   ;;  %s2184_s10 = smov 9  }
   0x8   :  { %s2259_s3 = sld [smem:[%s2679_s0 + %s2182_s30]]   ;;  %s2185_s15 = smov 10  }
   0x9   :  { %s2264_s8 = sld [smem:[%s2679_s0 + %s2183_s4]]   ;;  %s2186_s20 = smov 11  }
   0xa   :  { %s2269_s14 = sld [smem:[%s2679_s0 + %s2184_s10]]   ;;  %s2187_s26 = smov 12  }
   0xb   :  { %s2274_s19 = sld [smem:[%s2679_s0 + %s2185_s15]]   ;;  %s2188_s1 = smov 13  }
   0xc   :  { %s2279_s24 = sld [smem:[%s2679_s0 + %s2186_s20]]   ;;  %s2189_s7 = smov 14  }
   0xd   :  { %s2284_s30 = sld [smem:[%s2679_s0 + %s2187_s26]]   ;;  %s2190_s15 = smov 15  }
   0xe   :  { %2698 = sst [smem:[#allocation8_spill]] %s2259_s3  ;;  %s2191_s22 = smov 16  }
   0xf   :  { %s2289_s6 = sld [smem:[%s2679_s0 + %s2188_s1]]   ;;  %s2192_s28 = smov 17  }
  0x10   :  { %s2294_s12 = sld [smem:[%s2679_s0 + %s2189_s7]]   ;;  %s2193_s7 = smov 18  }
  0x11   :  { %s2299_s20 = sld [smem:[%s2679_s0 + %s2190_s15]]   ;;  %s2194_s15 = smov 19  }
  0x12   :  { %s2304_s27 = sld [smem:[%s2679_s0 + %s2191_s22]]   ;;  %s2195_s22 = smov 20  }
  0x13   :  { %s2309_s4 = sld [smem:[%s2679_s0 + %s2192_s28]]   ;;  %s2196_s28 = smov 21  }
  0x14   :  { %s2329_s10 = sld [smem:[%s2679_s0 + %s2196_s28]]   ;;  %s2200_s28 = smov 25  }
  0x15   :  { %s2204_s2 = smov 29   ;;  %s2205_s11 = smov 30  }
  0x16   :  { %2699 = sst [smem:[#allocation9_spill]] %s2294_s12 }
  0x17   :  { %2700 = sst [smem:[#allocation10_spill]] %s2299_s20 }
  0x18   :  { %2701 = sst [smem:[#allocation11_spill]] %s2304_s27 }
  0x19   :  { %2702 = sst [smem:[#allocation12_spill]] %s2309_s4 }
  0x1a   :  { %s2314_s12 = sld [smem:[%s2679_s0 + %s2193_s7]]   ;;  %s2197_s7 = smov 22  }
  0x1b   :  { %s2319_s20 = sld [smem:[%s2679_s0 + %s2194_s15]]   ;;  %s2198_s15 = smov 23  }
  0x1c   :  { %s2324_s27 = sld [smem:[%s2679_s0 + %s2195_s22]]   ;;  %s2199_s22 = smov 24  }
  0x1d   :  { %2706 = sst [smem:[#allocation16_spill]] %s2329_s10 }
  0x1e   :  { %s2334_s16 = sld [smem:[%s2679_s0 + %s2197_s7]]  }
  0x1f   :  { %s2339_s23 = sld [smem:[%s2679_s0 + %s2198_s15]]   ;;  %s2202_s15 = smov 27  }
  0x20   :  { %2703 = sst [smem:[#allocation13_spill]] %s2314_s12  ;;  %s2201_s12 = smov 26  }
  0x21   :  { %2704 = sst [smem:[#allocation14_spill]] %s2319_s20 }
  0x22   :  { %2705 = sst [smem:[#allocation15_spill]] %s2324_s27 }
  0x23   :  { %s2344_s1 = sld [smem:[%s2679_s0 + %s2199_s22]]   ;;  %s2203_s22 = smov 28  }
  0x24   :  { %2707 = sst [smem:[#allocation17_spill]] %s2334_s16 }
  0x25   :  { %2708 = sst [smem:[#allocation18_spill]] %s2339_s23 }
  0x26   :  { %s2349_s4 = sld [smem:[%s2679_s0 + %s2200_s28]]   ;;  %s67_s28 = sshll.u32 %s2224_s5, 4  ;;  %s68_s28 = int_to_ptr.vmem [resolvable:$true] %s67_s28 }
  0x27   :  { %s2354_s20 = sld [smem:[%s2679_s0 + %s2201_s12]]  }
  0x28   :  { %s2359_s27 = sld [smem:[%s2679_s0 + %s2202_s15]]   ;;  %s2098_s15 = sshra.s32 %s68_s28, 4  ;;  %s2099_s15 = int_to_ptr.vmem [resolvable:$true] %s2098_s15 }
  0x29   :  { %2709 = sst [smem:[#allocation19_spill]] %s2344_s1  ;;  %s2100_s18 = scalar_lea.vmem %s2099_s15, 2 }
  0x2a   :  { %s2364_s10 = sld [smem:[%s2679_s0 + %s2203_s22]]   ;;  %p2101_p0 = scmp.ne.s32.totalorder %s2099_s15, %s2100_s18 }
  0x2b   :  { %s2370_s12 = sld [smem:[%s2679_s0 + %s2204_s2]]   ;;  %s2102_s1 = scalar_lea.vmem %s2224_s5, 2 }
  0x2c   :  { %2710 = sst [smem:[#allocation20_spill]] %s2349_s4  ;;  %p2103_p1 = scmp.lt.s32.totalorder %s2099_s15, %s2224_s5 }
  0x2d   :  { %2711 = sst [smem:[#allocation21_spill]] %s2354_s20  ;;  %p2104_p2 = scmp.lt.s32.totalorder %s2102_s1, %s2100_s18 }
  0x2e   :  { %2712 = sst [smem:[#allocation22_spill]] %s2359_s27 }
  0x2f   :  { %s2375_s23 = sld [smem:[%s2679_s0 + %s2205_s11]]   ;;  %p2105_p3 = por %p2104_p2, %p2103_p1 }
  0x30   :  { %2713 = sst [smem:[#allocation23_spill]] %s2364_s10 }
  0x31   :  { %2714 = sst [smem:[#allocation24_spill]] %s2370_s12  ;;  %p2106_p4 = pnand %p2105_p3, %p2101_p0 }
  0x35   :  { %2715 = sst [smem:[#allocation25_spill]] %s2375_s23 }
  0x36   :  { %2109 = shalt.err (!%p2106_p4)  }
  0x37   :  { %s2206_s4 = smov [#allocation3]  }
  0x38   :  { %70 = dma.vmem_to_smem %s68_s28, 32, %s2206_s4, [#allocation2] }
  0x39   :  { %2154 = dma.done.wait [#allocation2], 32 }
  0x3a   :  { %2155 = vsyncadd [#allocation2], 4294967264 }
  0x3b   :  { %73 = sfence }
  0x3c   :  { %74 = vsyncpa [#allocation5], 0 }
  0x3d   :  { %76 = vsyncpa [#allocation5 + $0x1], 0  ;;  %s2379_s16 = smov 0   ;;  %s2381_s0 = smov 0  }
  0x3e   :  { %s2383_s20 = smov 0   ;;  %s2385_s22 = smov 0  }
  0x3f LB: > { %s2716_s3 = sld [smem:[#allocation8_spill]]  ;;  %s2400_s5 = sadd.s32 4294967295, %s2174_s22   ;;  %s2162_s16 = sphi %s2379_s16, %s2754_s16   ;;  %s2174_s22 = sphi %s2385_s22, %s2753_s22   ;;  %s2170_s20 = sphi %s2383_s20, %s2756_s20   ;;  %s2166_s0 = sphi %s2381_s0, %s2755_s0  }
  0x40   : > { %2717 = sst [smem:[#allocation26_spill]] %s2162_s16  ;;  %s1898_s26 = sadd.s32 4294967294, %s2174_s22  }
  0x41   : > { %2718 = sst [smem:[#allocation27_spill]] %s2166_s0  ;;  %s2404_s28 = sadd.s32 1, %s2174_s22  }
  0x42   : > { %2719 = sst [smem:[#allocation28_spill]] %s2170_s20  ;;  %s698_s2 = sadd.s32 1, %s2170_s20 }
  0x43   : > { %2720 = sst [smem:[#allocation29_spill]] %s2174_s22  ;;  %s695_s7 = ssub.s32 %s2174_s22, %s2404_s28 }
  0x44   : > { %2721 = sst [smem:[#allocation30_spill]] %s2400_s5  ;;  %p708_p5 = scmp.ne.s32.totalorder %s2170_s20, %s2166_s0 }
  0x45   : > { %2722 = sst [smem:[#allocation31_spill]] %s2404_s28  ;;  %p696_p6 = scmp.eq.s32.totalorder %s695_s7, 0 }
  0x46   : > { %p709_p7 = scmp.eq.s32.totalorder %s2400_s5, 1  ;;  %p714_p8 = scmp.ne.s32.totalorder %s2166_s0, %s2162_s16 }
  0x47   : > { %p715_p9 = scmp.eq.s32.totalorder %s1898_s26, 1  ;;  %p1900_p12 = scmp.ge.s32.totalorder %s2174_s22, 1 }
  0x48   : > { %s2415_s11 = scalar_select %p696_p6, %s2170_s20, %s698_s2  }
  0x49   : > { %p2417_p10 = por %p709_p7, %p708_p5  ;;  %p2421_p11 = por %p715_p9, %p714_p8 }
  0x4a   : > { %2723 = sst [smem:[#allocation32_spill]] %s2415_s11  ;;  %p820_p13 = scmp.lt.s32.totalorder %s2174_s22, 3 }
  0x4b   : > { %s2724_s15 = scalar_select %p2417_p10, 1, 0 }
  0x4c   : > { %s2726_s18 = scalar_select %p2421_p11, 1, 0 }
  0x4d   : > { %2725 = sst [smem:[#allocation33_spill]] %s2724_s15  ;;  %p821_p0 = pnand %p1900_p12, %p820_p13 }
  0x4e   : > { %2727 = sst [smem:[#allocation34_spill]] %s2726_s18  ;;  %s1902_s1 = sshll.u32 (!%p821_p0), %s2400_s5, 7 }
  0x4f   : > { %824 = sbr.rel (%p821_p0) target bundleno = 4172 (0x104c), region = 136  ;;  %s892_s4 = sld [smem:[#allocation3 + %s1902_s1]] (!%p821_p0) }
  0x50   : > { %s895_s26 = sadd.s32 (!%p821_p0), 1, %s1902_s1  ;;  %s899_s7 = sadd.s32 (!%p821_p0), 2, %s1902_s1 }
  0x51   : > { %s896_s2 = sld [smem:[#allocation3 + %s895_s26]] (!%p821_p0)  ;;  %s903_s20 = sadd.s32 (!%p821_p0), 3, %s1902_s1 }
  0x52   : > { %s900_s11 = sld [smem:[#allocation3 + %s899_s7]] (!%p821_p0)  ;;  %s907_s16 = sadd.s32 (!%p821_p0), 4, %s1902_s1 }
  0x53   : > { %s904_s28 = sld [smem:[#allocation3 + %s903_s20]] (!%p821_p0)  ;;  %s911_s18 = sadd.s32 (!%p821_p0), 5, %s1902_s1 }
  0x54   : > { %s908_s15 = sld [smem:[#allocation3 + %s907_s16]]  ;;  %s915_s22 = sadd.s32 6, %s1902_s1  ;;  %vm944_vm0 = vcmask 1040384   ;;  %vm946_vm1 = vcmask 1041408   ;;  %vm948_vm2 = vcmask 1042432   ;;  %vm950_vm3 = vcmask 1043456  }
  0x55   : > { %s912_s12 = sld [smem:[#allocation3 + %s911_s18]]  ;;  %s893_s23 = scalar_lea.vmem %s2229_s9, %s892_s4  ;;  %vm952_vm4 = vcmask 1044480   ;;  %vm954_vm5 = vcmask 1045504   ;;  %vm956_vm6 = vcmask 1046528   ;;  %v958_v21 = vld [vmem:[%s2234_s13] sm:$0xff]  ;;  %vm966_vm7 = vcmask 261120  }
  0x56   : > { %s916_s0 = sld [smem:[#allocation3 + %s915_s22]]  ;;  %v894_v0 = vld [vmem:[%s893_s23] sm:$0x1]  ;;  %s919_s27 = sadd.s32 7, %s1902_s1  ;;  %v2207_v25 = vmov 32.0   ;;  %v1007_v37 = vld [vmem:[%s2254_s29 + $0x18] sm:$0xff] }
  0x57   : > { %s897_s5 = scalar_lea.vmem %s2229_s9, %s896_s2  ;;  %s920_s10 = sld [smem:[#allocation3 + %s919_s27]]  ;;  %2054 = vrcp.f32 %v2207_v25  ;;  %1023 = vmatpush.msra.mxu0 %v1007_v37  ;;  %v1006_v38 = vld [vmem:[%s2254_s29 + $0x10] sm:$0xff]  ;;  %v1005_v39 = vld [vmem:[%s2254_s29 + $0x8] sm:$0xff]  ;;  %v1004_v40 = vld [vmem:[%s2254_s29] sm:$0xff]  ;;  %vm1053_vm12 = vcmask 64512   ;;  %vm1213_vm13 = vcmask 130048  }
  0x58   : > { %v898_v1 = vld [vmem:[%s897_s5] sm:$0x1]  ;;  %s901_s26 = scalar_lea.vmem %s2229_s9, %s900_s11  ;;  %s2211_s5 = smov 96   ;;  %v2487_v25 = vld [vmem:[%s2239_s17 + $0x18] sm:$0xff]  ;;  %vm1215_vm14 = vcmask 195584  }
  0x59   : > { %v902_v2 = vld [vmem:[%s901_s26] sm:$0x1]  ;;  %s905_s20 = scalar_lea.vmem %s2229_s9, %s904_s28  ;;  %v924_v3 = vrot.slane %v898_v1, 7  ;;  %1024 = vmatpush.msra.mxu0 %v1006_v38  ;;  %s2212_s28 = smov 64  }
  0x5a   : > { %v906_v4 = vld [vmem:[%s905_s20] sm:$0x1]  ;;  %s909_s16 = scalar_lea.vmem %s2229_s9, %s908_s15  ;;  %v927_v5 = vrot.slane %v902_v2, 6  ;;  %s2213_s11 = smov 8  }
  0x5b   : > { %v910_v6 = vld [vmem:[%s909_s16] sm:$0x1]  ;;  %s913_s22 = scalar_lea.vmem %s2229_s9, %s912_s12  ;;  %v930_v7 = vrot.slane %v906_v4, 5  ;;  %v945_v8 = vsel %vm944_vm0, %v894_v0, %v924_v3  ;;  %1025 = vmatpush.msra.mxu0 %v1005_v39  ;;  %s2209_s12 = smov 104  }
  0x5c   : > { %v914_v9 = vld [vmem:[%s913_s22] sm:$0x1]  ;;  %s917_s23 = scalar_lea.vmem %s2229_s9, %s916_s0  ;;  %v933_v10 = vrot.slane %v910_v6, 4  ;;  %v947_v11 = vsel %vm946_vm1, %v945_v8, %v927_v5  ;;  %s2210_s0 = smov 112  }
  0x5d   : > { %v918_v12 = vld [vmem:[%s917_s23] sm:$0x1]  ;;  %v936_v13 = vrot.slane %v914_v9, 3  ;;  %v949_v14 = vsel %vm948_vm2, %v947_v11, %v930_v7  ;;  %s921_s27 = scalar_lea.vmem %s2229_s9, %s920_s10  ;;  %v2055_v26 = vpop.eup %2054  ;;  %1026 = vmatpush.msra.mxu0 %v1004_v40  ;;  %s2208_s10 = smov 120  }
  0x5e   : > { %v939_v15 = vrot.slane %v918_v12, 2  ;;  %v951_v16 = vsel %vm950_vm3, %v949_v14, %v933_v10  ;;  %v922_v17 = vld [vmem:[%s921_s27] sm:$0x1]  ;;  %v971_v27 = vmul.f32 32.0, %v2055_v26  ;;  %vm975_vm8 = vweird.f32 %v2055_v26  ;;  %s2214_s15 = smov 16   ;;  %s2215_s18 = smov 24  }
  0x5f   : > { %v953_v18 = vsel %vm952_vm4, %v951_v16, %v936_v13  ;;  %v942_v19 = vrot.slane %v922_v17, 1  ;;  %v2037_v50 = vld [vmem:[%s2244_s21] ss:$0 sm:$0xff]  ;;  %v2477_v16 = vld [vmem:[%s2239_s17 + $0x8] sm:$0xff]  ;;  %s2728_s1 = sld [smem:[#allocation9_spill]] }
  0x60   : > { %v955_v20 = vsel %vm954_vm5, %v953_v18, %v939_v15  ;;  %v972_v28 = vsub.f32 1.0, %v971_v27  ;;  %v2038_v53 = vld [vmem:[%s2249_s25] ss:$0 sm:$0xff]  ;;  %s2729_s4 = sld [smem:[#allocation12_spill]] }
  0x61   : > { %v957_v22 = vsel %vm956_vm6, %v955_v20, %v942_v19  ;;  %v2472_v12 = vld [vmem:[%s2239_s17] sm:$0xff]  ;;  %v2482_v20 = vld [vmem:[%s2239_s17 + $0x10] sm:$0xff]  ;;  %s2730_s2 = sld [smem:[#allocation10_spill]] }
  0x62   : > { %v2437_v23 = vadd.f32 %v958_v21, %v957_v22  ;;  %v973_v29 = vmul.f32 %v2055_v26, %v972_v28  ;;  %s2731_s7 = sld [smem:[#allocation11_spill]] }
  0x63   : > { %s2732_s26 = sld [smem:[#allocation13_spill]] }
  0x64   : > { %v967_v24 = vsel %vm966_vm7, %v2437_v23, 0.0  ;;  %v974_v30 = vadd.f32 %v2055_v26, %v973_v29  ;;  %s2733_s20 = sld [smem:[#allocation14_spill]] }
  0x65   : > { %968 = vadd.xlane.f32.xlu0 %v967_v24  ;;  %s2734_s16 = sld [smem:[#allocation17_spill]] }
  0x66   : > { %v2441_v31 = vsel %vm975_vm8, %v2055_v26, %v974_v30  ;;  %s2736_s22 = sld [smem:[#allocation19_spill]] }
  0x6b   : > { %s2735_s23 = smov %s2734_s16 }
  0x6c   : > { %s2737_s27 = smov %s2736_s22 }
  0xd8   : > { %v969_v32 = vpop.xlane.xlu0 %968 }
  0xd9   : > { %v977_v33 = vmul.f32 %v2441_v31, %v969_v32 }
  0xdb   : > { %v978_v34 = vsub.f32 %v2437_v23, %v977_v33 }
  0xdd   : > { %v979_v35 = vmul.f32 %v978_v34, %v978_v34 }
  0xdf   : > { %v980_v36 = vsel %vm966_vm7, %v979_v35, 0.0 }
  0xe0   : > { %981 = vadd.xlane.f32.xlu0 %v980_v36 }
 0x153   : > { %v982_v41 = vpop.xlane.xlu0 %981 }
 0x154   : > { %v983_v42 = vmul.f32 %v982_v41, %v2441_v31 }
 0x156   : > { %v984_v43 = vadd.f32 1e-05, %v983_v42 }
 0x158   : > { %2056 = vrsqrt.f32 %v984_v43  ;;  %vm991_vm10 = vweird.f32 %v984_v43 }
 0x15e   : > { %v2057_v44 = vpop.eup %2056 }
 0x15f   : > { %v986_v45 = vmul.f32 %v2057_v44, %v984_v43  ;;  %vm992_vm9 = vweird.f32 %v2057_v44 }
 0x160   : > { %vm993_vm11 = vmor %vm991_vm10, %vm992_vm9 }
 0x161   : > { %v987_v46 = vmul.f32 %v2057_v44, %v986_v45 }
 0x163   : > { %v988_v47 = vmul.f32 0.5, %v987_v46 }
 0x165   : > { %v989_v48 = vsub.f32 1.5, %v988_v47 }
 0x167   : > { %v990_v49 = vmul.f32 %v2057_v44, %v989_v48 }
 0x169   : > { %v994_v51 = vsel %vm993_vm11, %v2057_v44, %v990_v49 }
 0x16a   : > { %v995_v52 = vmul.f32 %v994_v51, %v978_v34 }
 0x16c   : > { %v999_v54 = vmul.f32 %v2037_v50, %v995_v52 }
 0x16e   : > { %v1003_v55 = vadd.f32 %v2038_v53, %v999_v54 }
 0x170   : > { %1903 = vmatmul.msk.f32.vlgmr.msra.gmra.mxu0 %vm966_vm7, %v1003_v55 }
 0x1ed   : > { %v1028_v56 = vpop.f32.mrf.mxu0 }
 0x1ee   : > { %1032 = vrot.lane.b32.xlu2 %v1028_v56, %s2208_s10  ;;  %1038 = vrot.lane.b32.xlu1 %v1028_v56, %s2209_s12  ;;  %v1041_v7 = vmul.f32 0.17677669, %v1028_v56 }
 0x1f6   : > { %1035 = vrot.lane.b32.xlu1 %v1028_v56, %s2210_s0 }
 0x248   : > { %v1033_v57 = vpop.permute.xlu2 %1032 }
 0x249   : > { %1047 = vrot.lane.b32.xlu1 %v1033_v57, %s2211_s5  ;;  %v2022_v60 = vpack.i.bf16 %v1028_v56, %v1033_v57  ;;  %v1042_v9 = vmul.f32 0.17677669, %v1033_v57 }
 0x260   : > { %v1039_v58 = vpop.permute.xlu1 %1038 }
 0x261   : > { %1051 = vrot.lane.b32.xlu2 %v1039_v58, %s2211_s5  ;;  %v1044_v11 = vmul.f32 0.17677669, %v1039_v58 }
 0x268   : > { %v1036_v59 = vpop.permute.xlu1 %1035 }
 0x269   : > { %1045 = vrot.lane.b32.xlu2 %v1028_v56, %s2211_s5  ;;  %1049 = vrot.lane.b32.xlu0 %v1036_v59, %s2211_s5  ;;  %v2017_v61 = vpack.i.bf16 %v1036_v59, %v1039_v58  ;;  %v1043_v10 = vmul.f32 0.17677669, %v1036_v59 }
 0x271   : > { %2018 = vrot.lane.b32.xlu2 %v2017_v61, %s2212_s28  ;;  %2023 = vrot.lane.b32.xlu0 %v2022_v60, %s2212_s28 }
 0x2bb   : > { %v1052_v62 = vpop.permute.xlu2 %1051  ;;  %v1048_v4 = vpop.permute.xlu1 %1047 }
 0x2bc   : > { %1904 = vmatpush.xpose.msk.msra.mxu1 %vm1053_vm12, %v1052_v62 }
 0x2c3   : > { %v1046_v63 = vpop.permute.xlu2 %1045 }
 0x2cb   : > { %v2019_v0 = vpop.permute.xlu2 %2018 }
 0x2cc   : > { %v2020_v1 = vunpack.i.l.bf16 %v2019_v0  ;;  %v2021_v2 = vunpack.i.h.bf16 %v2019_v0  ;;  %v1219_v0 = vld [vmem:[%s2716_s3 + $0x10] sm:$0xff] }
 0x2ce   : > { %1175 = vmatpush.msra.mxu2 %v2020_v1  ;;  %v1218_v1 = vld [vmem:[%s2716_s3 + $0x8] sm:$0xff] }
 0x2d0   : > { %1176 = vmatpush.msra.mxu2 %v2021_v2  ;;  %v1217_v2 = vld [vmem:[%s2716_s3] sm:$0xff] }
 0x2db   : > { %v1050_v3 = vpop.permute.xlu0 %1049 }
 0x2dc   : > { %1905 = vmatpush.xpose.msk.msra.mxu1 %vm1053_vm12, %v1050_v3 }
 0x2e0   : > { %1906 = vmatpush.xpose.msk.msra.mxu1 %vm1053_vm12, %v1048_v4 }
 0x2e3   : > { %v2024_v5 = vpop.permute.xlu0 %2023 }
 0x2e4   : > { %1907 = vmatpush.xpose.msk.msra.mxu1 %vm1053_vm12, %v1046_v63  ;;  %v2025_v6 = vunpack.i.l.bf16 %v2024_v5  ;;  %v2026_v8 = vunpack.i.h.bf16 %v2024_v5  ;;  %v1220_v63 = vld [vmem:[%s2716_s3 + $0x18] sm:$0xff] }
 0x2e5   : > { %1240 = vmatpush.msra.mxu3 %v1220_v63 }
 0x2e6   : > { %1177 = vmatpush.msra.mxu2 %v2025_v6 }
 0x2e7   : > { %1908 = vmatmul.msk.f32.vlgmr.msra.gmra.mxu1 %vm1053_vm12, %v1041_v7  ;;  %1241 = vmatpush.msra.mxu3 %v1219_v0 }
 0x2e8   : > { %1178 = vmatpush.msra.mxu2 %v2026_v8 }
 0x2e9   : > { %1242 = vmatpush.msra.mxu3 %v1218_v1 }
 0x2eb   : > { %1243 = vmatpush.msra.mxu3 %v1217_v2  ;;  %v2043_v2 = vld [vmem:[%s2728_s1] ss:$0 sm:$0xff]  ;;  %s2746_s1 = sld [smem:[#allocation30_spill]] }
 0x2ef   : > { %1909 = vmatmul.msk.f32.gmra.mxu1 %vm1053_vm12, %v1042_v9 }
 0x2f7   : > { %1910 = vmatmul.msk.f32.gmra.mxu1 %vm1053_vm12, %v1043_v10 }
 0x2ff   : > { %1911 = vmatmul.msk.f32.gmra.mxu1 %vm1053_vm12, %v1044_v11 }
 0x364   : > { %v1091_v13 = vpop.f32.mrf.mxu1 }
 0x365   : > { %v1092_v14 = vadd.f32 %v1091_v13, %v2472_v12  ;;  %v2039_v13 = vld [vmem:[%s2264_s8] ss:$0 sm:$0xff] }
 0x367   : > { %v1103_v15 = vsel %vm966_vm7, %v1092_v14, -inf }
 0x368   : > { %1104 = vmax.xlane.f32.xlu1 %v1103_v15 }
 0x36c   : > { %v1094_v17 = vpop.f32.mrf.mxu1 }
 0x36d   : > { %v1095_v18 = vadd.f32 %v1094_v17, %v2477_v16 }
 0x36f   : > { %v1106_v19 = vsel %vm966_vm7, %v1095_v18, -inf }
 0x370   : > { %1107 = vmax.xlane.f32.xlu2 %v1106_v19 }
 0x374   : > { %v1097_v21 = vpop.f32.mrf.mxu1 }
 0x375   : > { %v1098_v22 = vadd.f32 %v1097_v21, %v2482_v20 }
 0x377   : > { %v1109_v24 = vsel %vm966_vm7, %v1098_v22, -inf }
 0x378   : > { %1110 = vmax.xlane.f32.xlu0 %v1109_v24 }
 0x37c   : > { %v1100_v26 = vpop.f32.mrf.mxu1 }
 0x37d   : > { %v1101_v27 = vadd.f32 %v1100_v26, %v2487_v25 }
 0x37f   : > { %v1112_v28 = vsel %vm966_vm7, %v1101_v27, -inf }
 0x380   : > { %1113 = vmax.xlane.f32.xlu1 %v1112_v28  ;;  %v1282_v28 = vld [vmem:[%s2279_s24 + $0x8] sm:$0xff] }
 0x3db   : > { %v1105_v29 = vpop.xlane.xlu1 %1104 }
 0x3dc   : > { %v1115_v30 = vsub.f32 %v1092_v14, %v1105_v29  ;;  %v1281_v29 = vld [vmem:[%s2279_s24] sm:$0xff] }
 0x3de   : > { %v1119_v32 = vmul.f32 1.442695, %v1115_v30  ;;  %v1328_v30 = vld [vmem:[%s2289_s6 + $0x78] sm:$0xff] }
 0x3df   : > { %1333 = vmatpush.msrb.mxu2 %v1328_v30 }
 0x3e0   : > { %2058 = vpow2.f32 %v1119_v32  ;;  %v1327_v32 = vld [vmem:[%s2289_s6 + $0x70] sm:$0xff] }
 0x3e1   : > { %1334 = vmatpush.msrb.mxu2 %v1327_v32 }
 0x3e3   : > { %v1108_v33 = vpop.xlane.xlu2 %1107 }
 0x3e4   : > { %v1116_v34 = vsub.f32 %v1095_v18, %v1108_v33  ;;  %v1326_v33 = vld [vmem:[%s2289_s6 + $0x68] sm:$0xff] }
 0x3e5   : > { %1335 = vmatpush.msrb.mxu2 %v1326_v33  ;;  %v2045_v33 = vld [vmem:[%s2731_s7] ss:$0 sm:$0xff]  ;;  %s2748_s7 = sld [smem:[#allocation24_spill]] }
 0x3e6   : > { %v2059_v35 = vpop.eup %2058  ;;  %v1121_v36 = vmul.f32 1.442695, %v1116_v34 }
 0x3e7   : > { %1912 = vmatmul.msk.f32.vlgmr.msra.gmra.mxu2 %vm966_vm7, %v2059_v35  ;;  %v1127_v48 = vsel %vm966_vm7, %v2059_v35, 0.0 }
 0x3e8   : > { %2060 = vpow2.f32 %v1121_v36  ;;  %v1325_v36 = vld [vmem:[%s2289_s6 + $0x60] sm:$0xff] }
 0x3e9   : > { %1336 = vmatpush.msrb.mxu2 %v1325_v36 }
 0x3eb   : > { %v1111_v37 = vpop.xlane.xlu0 %1110 }
 0x3ec   : > { %v1117_v38 = vsub.f32 %v1098_v22, %v1111_v37 }
 0x3ee   : > { %v2061_v39 = vpop.eup %2060  ;;  %v1123_v40 = vmul.f32 1.442695, %v1117_v38  ;;  %v1324_v38 = vld [vmem:[%s2289_s6 + $0x58] sm:$0xff] }
 0x3ef   : > { %1913 = vmatmul.msk.f32.gmra.mxu2 %vm966_vm7, %v2061_v39  ;;  %v1130_v41 = vsel %vm966_vm7, %v2061_v39, 0.0  ;;  %v1323_v39 = vld [vmem:[%s2289_s6 + $0x50] sm:$0xff] }
 0x3f0   : > { %2062 = vpow2.f32 %v1123_v40  ;;  %1131 = vadd.xlane.f32.xlu2 %v1130_v41  ;;  %1337 = vmatpush.msrb.mxu2 %v1324_v38  ;;  %v1322_v40 = vld [vmem:[%s2289_s6 + $0x48] sm:$0xff]  ;;  %v1321_v41 = vld [vmem:[%s2289_s6 + $0x40] sm:$0xff] }
 0x3f2   : > { %1338 = vmatpush.msrb.mxu2 %v1323_v39 }
 0x3f3   : > { %v1114_v42 = vpop.xlane.xlu1 %1113 }
 0x3f4   : > { %v1118_v43 = vsub.f32 %v1101_v27, %v1114_v42  ;;  %v1284_v27 = vld [vmem:[%s2279_s24 + $0x18] sm:$0xff]  ;;  %1339 = vmatpush.msrb.mxu2 %v1322_v40 }
 0x3f5   : > { %1304 = vmatpush.msrb.mxu0 %v1284_v27 }
 0x3f6   : > { %v2063_v44 = vpop.eup %2062  ;;  %v1125_v45 = vmul.f32 1.442695, %v1118_v43  ;;  %v1320_v43 = vld [vmem:[%s2289_s6 + $0x38] sm:$0xff]  ;;  %1340 = vmatpush.msrb.mxu2 %v1321_v41 }
 0x3f7   : > { %1914 = vmatmul.msk.f32.gmra.mxu2 %vm966_vm7, %v2063_v44  ;;  %v1133_v46 = vsel %vm966_vm7, %v2063_v44, 0.0 }
 0x3f8   : > { %2064 = vpow2.f32 %v1125_v45  ;;  %1134 = vadd.xlane.f32.xlu1 %v1133_v46  ;;  %v1319_v45 = vld [vmem:[%s2289_s6 + $0x30] sm:$0xff]  ;;  %1341 = vmatpush.msrb.mxu2 %v1320_v43 }
 0x3fa   : > { %1342 = vmatpush.msrb.mxu2 %v1319_v45 }
 0x3fe   : > { %v2065_v47 = vpop.eup %2064 }
 0x3ff   : > { %1915 = vmatmul.msk.f32.gmra.mxu2 %vm966_vm7, %v2065_v47  ;;  %v1136_v49 = vsel %vm966_vm7, %v2065_v47, 0.0  ;;  %v1318_v47 = vld [vmem:[%s2289_s6 + $0x28] sm:$0xff] }
 0x400   : > { %1128 = vadd.xlane.f32.xlu1 %v1127_v48  ;;  %1137 = vadd.xlane.f32.xlu2 %v1136_v49  ;;  %v1317_v49 = vld [vmem:[%s2289_s6 + $0x20] sm:$0xff] }
 0x401   : > { %1343 = vmatpush.msrb.mxu2 %v1318_v47 }
 0x403   : > { %1344 = vmatpush.msrb.mxu2 %v1317_v49 }
 0x463   : > { %v1132_v50 = vpop.xlane.xlu2 %1131 }
 0x464   : > { %2066 = vrcp.f32 %v1132_v50 }
 0x46a   : > { %v1180_v51 = vpop.f32.mrf.mxu2  ;;  %v2067_v53 = vpop.eup %2066 }
 0x46b   : > { %v1135_v52 = vpop.xlane.xlu1 %1134 }
 0x46c   : > { %2068 = vrcp.f32 %v1135_v52 }
 0x472   : > { %v1183_v54 = vpop.f32.mrf.mxu2  ;;  %v2069_v57 = vpop.eup %2068 }
 0x473   : > { %v1197_v55 = vmul.f32 %v2067_v53, %v1183_v54  ;;  %v1138_v56 = vpop.xlane.xlu2 %1137  ;;  %v1129_v3 = vpop.xlane.xlu1 %1128  ;;  %v2040_v53 = vld [vmem:[%s2269_s14] ss:$0 sm:$0xff]  ;;  %v1315_v54 = vld [vmem:[%s2289_s6 + $0x10] sm:$0xff] }
 0x474   : > { %2070 = vrcp.f32 %v1138_v56 }
 0x475   : > { %1201 = vrot.lane.b32.xlu0 %v1197_v55, %s2213_s11  ;;  %2072 = vrcp.f32 %v1129_v3 }
 0x47a   : > { %v1186_v58 = vpop.f32.mrf.mxu2  ;;  %v2071_v60 = vpop.eup %2070 }
 0x47b   : > { %v1198_v59 = vmul.f32 %v2069_v57, %v1186_v58  ;;  %v2073_v4 = vpop.eup %2072  ;;  %v2041_v57 = vld [vmem:[%s2274_s19] ss:$0 sm:$0xff] }
 0x47c   : > { %v1196_v6 = vmul.f32 %v2073_v4, %v1180_v51  ;;  %v1316_v51 = vld [vmem:[%s2289_s6 + $0x18] sm:$0xff] }
 0x47d   : > { %1205 = vrot.lane.b32.xlu2 %v1198_v59, %s2214_s15  ;;  %1345 = vmatpush.msrb.mxu2 %v1316_v51 }
 0x47f   : > { %1346 = vmatpush.msrb.mxu2 %v1315_v54 }
 0x482   : > { %v1189_v61 = vpop.f32.mrf.mxu2 }
 0x483   : > { %v1199_v62 = vmul.f32 %v2071_v60, %v1189_v61  ;;  %v1314_v60 = vld [vmem:[%s2289_s6 + $0x8] sm:$0xff]  ;;  %v1313_v61 = vld [vmem:[%s2289_s6] sm:$0xff] }
 0x484   : > { %1347 = vmatpush.msrb.mxu2 %v1314_v60 }
 0x485   : > { %1209 = vrot.lane.b32.xlu1 %v1199_v62, %s2215_s18  ;;  %v2042_v62 = vld [vmem:[%s2284_s30] ss:$0 sm:$0xff] }
 0x486   : > { %1348 = vmatpush.msrb.mxu2 %v1313_v61 }
 0x4d7   : > { %v1206_v8 = vpop.permute.xlu2 %1205 }
 0x4e7   : > { %v1202_v5 = vpop.permute.xlu0 %1201 }
 0x4e8   : > { %v1212_v7 = vsel %vm1053_vm12, %v1196_v6, %v1202_v5 }
 0x4e9   : > { %v1214_v10 = vsel %vm1213_vm13, %v1212_v7, %v1206_v8 }
 0x4f7   : > { %v1210_v9 = vpop.permute.xlu1 %1209 }
 0x4f8   : > { %v1216_v11 = vsel %vm1215_vm14, %v1214_v10, %v1210_v9 }
 0x4f9   : > { %1916 = vmatmul.msk.f32.vlgmr.msra.gmra.mxu3 %vm966_vm7, %v1216_v11 }
 0x57c   : > { %v1245_v14 = vpop.f32.mrf.mxu3 }
 0x57d   : > { %v1246_v15 = vadd.f32 %v2039_v13, %v1245_v14  ;;  %v1389_v13 = vld [vmem:[%s2729_s4 + $0x18] sm:$0xff]  ;;  %v1388_v14 = vld [vmem:[%s2729_s4 + $0x10] sm:$0xff] }
 0x57e   : > { %1405 = vmatpush.msrb.mxu3 %v1389_v13 }
 0x57f   : > { %v2512_v17 = vadd.f32 %v1246_v15, %v2437_v23  ;;  %v1283_v23 = vld [vmem:[%s2279_s24 + $0x10] sm:$0xff]  ;;  %v1387_v15 = vld [vmem:[%s2729_s4 + $0x8] sm:$0xff] }
 0x580   : > { %1305 = vmatpush.msrb.mxu0 %v1283_v23  ;;  %1406 = vmatpush.msrb.mxu3 %v1388_v14 }
 0x581   : > { %v1251_v18 = vsel %vm966_vm7, %v2512_v17, 0.0 }
 0x582   : > { %1252 = vadd.xlane.f32.xlu0 %v1251_v18  ;;  %1306 = vmatpush.msrb.mxu0 %v1282_v28 }
 0x583   : > { %1407 = vmatpush.msrb.mxu3 %v1387_v15 }
 0x584   : > { %1307 = vmatpush.msrb.mxu0 %v1281_v29  ;;  %v2044_v29 = vld [vmem:[%s2730_s2] ss:$0 sm:$0xff]  ;;  %s2747_s2 = sld [smem:[#allocation25_spill]] }
 0x5f5   : > { %v1253_v19 = vpop.xlane.xlu0 %1252 }
 0x5f6   : > { %v1254_v21 = vmul.f32 %v1253_v19, %v2441_v31 }
 0x5f8   : > { %v1255_v22 = vsub.f32 %v2512_v17, %v1254_v21 }
 0x5fa   : > { %v1256_v24 = vmul.f32 %v1255_v22, %v1255_v22 }
 0x5fc   : > { %v1257_v26 = vsel %vm966_vm7, %v1256_v24, 0.0 }
 0x5fd   : > { %1258 = vadd.xlane.f32.xlu2 %v1257_v26 }
 0x670   : > { %v1259_v34 = vpop.xlane.xlu2 %1258 }
 0x671   : > { %v1260_v35 = vmul.f32 %v1259_v34, %v2441_v31 }
 0x673   : > { %v1261_v37 = vadd.f32 1e-05, %v1260_v35 }
 0x675   : > { %2074 = vrsqrt.f32 %v1261_v37  ;;  %vm1268_vm0 = vweird.f32 %v1261_v37 }
 0x67b   : > { %v2075_v42 = vpop.eup %2074 }
 0x67c   : > { %v1263_v44 = vmul.f32 %v2075_v42, %v1261_v37  ;;  %vm1269_vm15 = vweird.f32 %v2075_v42 }
 0x67d   : > { %vm1270_vm1 = vmor %vm1268_vm0, %vm1269_vm15 }
 0x67e   : > { %v1264_v46 = vmul.f32 %v2075_v42, %v1263_v44 }
 0x680   : > { %v1265_v48 = vmul.f32 0.5, %v1264_v46 }
 0x682   : > { %v1266_v50 = vsub.f32 1.5, %v1265_v48 }
 0x684   : > { %v1267_v52 = vmul.f32 %v2075_v42, %v1266_v50 }
 0x686   : > { %v1271_v55 = vsel %vm1270_vm1, %v2075_v42, %v1267_v52 }
 0x687   : > { %v1272_v56 = vmul.f32 %v1271_v55, %v1255_v22 }
 0x689   : > { %v1276_v58 = vmul.f32 %v2040_v53, %v1272_v56 }
 0x68b   : > { %v1280_v59 = vadd.f32 %v2041_v57, %v1276_v58 }
 0x68d   : > { %1917 = vmatmul.msk.f32.vlgmr.msrb.gmra.mxu0 %vm966_vm7, %v1280_v59 }
 0x70a   : > { %v1309_v63 = vpop.f32.mrf.mxu0 }
 0x70b   : > { %v1310_v0 = vadd.f32 %v2042_v62, %v1309_v63 }
 0x70d   : > { %v1312_v1 = vmax.f32 %v1310_v0, 0.0 }
 0x70f   : > { %1349 = vmatmul.f32.vlgmr.msrb.gmra.mxu2 %v1312_v1 }
 0x792   : > { %v1350_v3 = vpop.f32.mrf.mxu2 }
 0x793   : > { %v1351_v4 = vadd.f32 %v2043_v2, %v1350_v3 }
 0x795   : > { %v2546_v5 = vadd.f32 %v1351_v4, %v2512_v17  ;;  %v1386_v17 = vld [vmem:[%s2729_s4] sm:$0xff] }
 0x796   : > { %1408 = vmatpush.msrb.mxu3 %v1386_v17 }
 0x797   : > { %v1356_v6 = vsel %vm966_vm7, %v2546_v5, 0.0 }
 0x798   : > { %1357 = vadd.xlane.f32.xlu1 %v1356_v6 }
 0x80b   : > { %v1358_v7 = vpop.xlane.xlu1 %1357 }
 0x80c   : > { %v1359_v8 = vmul.f32 %v1358_v7, %v2441_v31 }
 0x80e   : > { %v1360_v9 = vsub.f32 %v2546_v5, %v1359_v8 }
 0x810   : > { %v1361_v10 = vmul.f32 %v1360_v9, %v1360_v9 }
 0x812   : > { %v1362_v11 = vsel %vm966_vm7, %v1361_v10, 0.0 }
 0x813   : > { %1363 = vadd.xlane.f32.xlu0 %v1362_v11 }
 0x886   : > { %v1364_v18 = vpop.xlane.xlu0 %1363 }
 0x887   : > { %v1365_v19 = vmul.f32 %v1364_v18, %v2441_v31 }
 0x889   : > { %v1366_v21 = vadd.f32 1e-05, %v1365_v19 }
 0x88b   : > { %2076 = vrsqrt.f32 %v1366_v21  ;;  %vm1373_vm3 = vweird.f32 %v1366_v21 }
 0x891   : > { %v2077_v22 = vpop.eup %2076 }
 0x892   : > { %v1368_v24 = vmul.f32 %v2077_v22, %v1366_v21  ;;  %vm1374_vm2 = vweird.f32 %v2077_v22 }
 0x893   : > { %vm1375_vm4 = vmor %vm1373_vm3, %vm1374_vm2 }
 0x894   : > { %v1369_v26 = vmul.f32 %v2077_v22, %v1368_v24 }
 0x896   : > { %v1370_v27 = vmul.f32 0.5, %v1369_v26  ;;  %v1599_v26 = vld [vmem:[%s2732_s26 + $0x18] sm:$0xff] }
 0x897   : > { %1619 = vmatpush.msrb.mxu1 %v1599_v26  ;;  %v1694_v26 = vld [vmem:[%s2737_s27 + $0x10] sm:$0xff] }
 0x898   : > { %v1371_v23 = vsub.f32 1.5, %v1370_v27  ;;  %v1598_v27 = vld [vmem:[%s2732_s26 + $0x10] sm:$0xff] }
 0x899   : > { %1620 = vmatpush.msrb.mxu1 %v1598_v27 }
 0x89a   : > { %v1372_v28 = vmul.f32 %v2077_v22, %v1371_v23 }
 0x89c   : > { %v1376_v30 = vsel %vm1375_vm4, %v2077_v22, %v1372_v28 }
 0x89d   : > { %v1377_v32 = vmul.f32 %v1376_v30, %v1360_v9 }
 0x89f   : > { %v1381_v34 = vmul.f32 %v2044_v29, %v1377_v32 }
 0x8a1   : > { %v1385_v35 = vadd.f32 %v2045_v33, %v1381_v34 }
 0x8a3   : > { %1918 = vmatmul.msk.f32.vlgmr.msrb.gmra.mxu3 %vm966_vm7, %v1385_v35 }
 0x926   : > { %v1410_v36 = vpop.f32.mrf.mxu3 }
 0x927   : > { %1414 = vrot.lane.b32.xlu1 %v1410_v36, %s2208_s10  ;;  %1417 = vrot.lane.b32.xlu0 %v1410_v36, %s2210_s0  ;;  %v1423_v46 = vmul.f32 0.17677669, %v1410_v36  ;;  %s2738_s10 = sld [smem:[#allocation15_spill]] }
 0x928   : > { %1420 = vrot.lane.b32.xlu2 %v1410_v36, %s2209_s12  ;;  %s2739_s12 = sld [smem:[#allocation16_spill]] }
 0x929   : > { %s2740_s0 = sld [smem:[#allocation18_spill]] }
 0x982   : > { %v1421_v37 = vpop.permute.xlu2 %1420 }
 0x983   : > { %1433 = vrot.lane.b32.xlu0 %v1421_v37, %s2211_s5  ;;  %v1426_v55 = vmul.f32 0.17677669, %v1421_v37 }
 0x98b   : > { %1427 = vrot.lane.b32.xlu0 %v1410_v36, %s2211_s5 }
 0x999   : > { %v1415_v38 = vpop.permute.xlu1 %1414  ;;  %v1418_v39 = vpop.permute.xlu0 %1417 }
 0x99a   : > { %1429 = vrot.lane.b32.xlu1 %v1415_v38, %s2211_s5  ;;  %1431 = vrot.lane.b32.xlu2 %v1418_v39, %s2211_s5  ;;  %v2027_v40 = vpack.i.bf16 %v1418_v39, %v1421_v37  ;;  %v2032_v41 = vpack.i.bf16 %v1410_v36, %v1415_v38  ;;  %v1424_v50 = vmul.f32 0.17677669, %v1415_v38  ;;  %v1425_v54 = vmul.f32 0.17677669, %v1418_v39  ;;  %s2741_s5 = sld [smem:[#allocation20_spill]] }
 0x9a2   : > { %2028 = vrot.lane.b32.xlu1 %v2027_v40, %s2212_s28 }
 0x9aa   : > { %2033 = vrot.lane.b32.xlu1 %v2032_v41, %s2212_s28  ;;  %v1597_v41 = vld [vmem:[%s2732_s26 + $0x8] sm:$0xff]  ;;  %s2742_s28 = sld [smem:[#allocation23_spill]] }
 0x9ab   : > { %1621 = vmatpush.msrb.mxu1 %v1597_v41 }
 0x9f4   : > { %v1432_v43 = vpop.permute.xlu2 %1431 }
 0x9f5   : > { %v1434_v42 = vpop.permute.xlu0 %1433 }
 0x9f6   : > { %1919 = vmatpush.xpose.msk.msra.mxu0 %vm1053_vm12, %v1434_v42  ;;  %v1596_v42 = vld [vmem:[%s2732_s26] sm:$0xff] }
 0x9f7   : > { %1622 = vmatpush.msrb.mxu1 %v1596_v42 }
 0x9fa   : > { %1920 = vmatpush.xpose.msk.msra.mxu0 %vm1053_vm12, %v1432_v43 }
 0x9fd   : > { %v1428_v45 = vpop.permute.xlu0 %1427 }
 0xa0c   : > { %v1430_v44 = vpop.permute.xlu1 %1429 }
 0xa0d   : > { %1921 = vmatpush.xpose.msk.msra.mxu0 %vm1053_vm12, %v1430_v44 }
 0xa11   : > { %1922 = vmatpush.xpose.msk.msra.mxu0 %vm1053_vm12, %v1428_v45 }
 0xa14   : > { %v2029_v47 = vpop.permute.xlu1 %2028  ;;  %1923 = vmatmul.msk.f32.vlgmr.msra.gmra.mxu0 %vm1053_vm12, %v1423_v46 }
 0xa15   : > { %v2030_v48 = vunpack.i.l.bf16 %v2029_v47  ;;  %v2031_v49 = vunpack.i.h.bf16 %v2029_v47 }
 0xa17   : > { %1556 = vmatpush.msra.mxu3 %v2030_v48 }
 0xa19   : > { %1557 = vmatpush.msra.mxu3 %v2031_v49 }
 0xa1c   : > { %v2034_v51 = vpop.permute.xlu1 %2033  ;;  %1924 = vmatmul.msk.f32.gmra.mxu0 %vm1053_vm12, %v1424_v50 }
 0xa1d   : > { %v2035_v52 = vunpack.i.l.bf16 %v2034_v51  ;;  %v2036_v53 = vunpack.i.h.bf16 %v2034_v51 }
 0xa1f   : > { %1558 = vmatpush.msra.mxu3 %v2035_v52  ;;  %v2046_v52 = vld [vmem:[%s2733_s20] ss:$0 sm:$0xff] }
 0xa21   : > { %1559 = vmatpush.msra.mxu3 %v2036_v53 }
 0xa24   : > { %1925 = vmatmul.msk.f32.gmra.mxu0 %vm1053_vm12, %v1425_v54 }
 0xa2c   : > { %1926 = vmatmul.msk.f32.gmra.mxu0 %vm1053_vm12, %v1426_v55 }
 0xa91   : > { %v1472_v56 = vpop.f32.mrf.mxu0 }
 0xa92   : > { %v1473_v57 = vadd.f32 %v1472_v56, %v2472_v12 }
 0xa94   : > { %v1484_v58 = vsel %vm966_vm7, %v1473_v57, -inf }
 0xa95   : > { %1485 = vmax.xlane.f32.xlu2 %v1484_v58 }
 0xa99   : > { %v1475_v59 = vpop.f32.mrf.mxu0 }
 0xa9a   : > { %v1476_v60 = vadd.f32 %v1475_v59, %v2477_v16 }
 0xa9c   : > { %v1487_v61 = vsel %vm966_vm7, %v1476_v60, -inf }
 0xa9d   : > { %1488 = vmax.xlane.f32.xlu0 %v1487_v61 }
 0xaa1   : > { %v1478_v62 = vpop.f32.mrf.mxu0 }
 0xaa2   : > { %v1479_v63 = vadd.f32 %v1478_v62, %v2482_v20  ;;  %v1663_v62 = vld [vmem:[%s2734_s16 + $0x18] sm:$0xff] }
 0xaa3   : > { %1683 = vmatpush.msra.mxu2 %v1663_v62 }
 0xaa4   : > { %v1490_v0 = vsel %vm966_vm7, %v1479_v63, -inf }
 0xaa5   : > { %1491 = vmax.xlane.f32.xlu1 %v1490_v0  ;;  %v1660_v0 = vld [vmem:[%s2735_s23] sm:$0xff] }
 0xaa9   : > { %v1481_v1 = vpop.f32.mrf.mxu0 }
 0xaaa   : > { %v1482_v2 = vadd.f32 %v1481_v1, %v2487_v25  ;;  %v1707_v1 = vld [vmem:[%s2736_s22 + $0x78] sm:$0xff]  ;;  %s1935_s22 = sshll.u32 %s2746_s1, 3 }
 0xaab   : > { %1712 = vmatpush.msrb.mxu3 %v1707_v1  ;;  %v2053_v1 = vld [vmem:[%s2748_s7] ss:$0 sm:$0xff] }
 0xaac   : > { %v1493_v12 = vsel %vm966_vm7, %v1482_v2, -inf }
 0xaad   : > { %1494 = vmax.xlane.f32.xlu2 %v1493_v12  ;;  %v1705_v12 = vld [vmem:[%s2737_s27 + $0x68] sm:$0xff] }
 0xb08   : > { %v1486_v3 = vpop.xlane.xlu2 %1485 }
 0xb09   : > { %v1496_v4 = vsub.f32 %v1473_v57, %v1486_v3 }
 0xb0b   : > { %v1500_v6 = vmul.f32 1.442695, %v1496_v4 }
 0xb0d   : > { %2078 = vpow2.f32 %v1500_v6  ;;  %v1704_v6 = vld [vmem:[%s2737_s27 + $0x60] sm:$0xff] }
 0xb10   : > { %v1489_v16 = vpop.xlane.xlu0 %1488 }
 0xb11   : > { %v1497_v7 = vsub.f32 %v1476_v60, %v1489_v16 }
 0xb13   : > { %v2079_v8 = vpop.eup %2078  ;;  %v1502_v9 = vmul.f32 1.442695, %v1497_v7  ;;  %v1703_v7 = vld [vmem:[%s2737_s27 + $0x58] sm:$0xff] }
 0xb14   : > { %1927 = vmatmul.msk.f32.vlgmr.msra.gmra.mxu3 %vm966_vm7, %v2079_v8  ;;  %v1508_v22 = vsel %vm966_vm7, %v2079_v8, 0.0  ;;  %v1702_v8 = vld [vmem:[%s2737_s27 + $0x50] sm:$0xff] }
 0xb15   : > { %2080 = vpow2.f32 %v1502_v9  ;;  %v1701_v9 = vld [vmem:[%s2737_s27 + $0x48] sm:$0xff] }
 0xb18   : > { %v1492_v20 = vpop.xlane.xlu1 %1491 }
 0xb19   : > { %v1498_v10 = vsub.f32 %v1479_v63, %v1492_v20  ;;  %v1661_v63 = vld [vmem:[%s2735_s23 + $0x8] sm:$0xff]  ;;  %v1700_v20 = vld [vmem:[%s2737_s27 + $0x40] sm:$0xff] }
 0xb1b   : > { %v2081_v11 = vpop.eup %2080  ;;  %v1504_v13 = vmul.f32 1.442695, %v1498_v10 }
 0xb1c   : > { %1928 = vmatmul.msk.f32.gmra.mxu3 %vm966_vm7, %v2081_v11  ;;  %v1511_v25 = vsel %vm966_vm7, %v2081_v11, 0.0  ;;  %v1699_v11 = vld [vmem:[%s2737_s27 + $0x38] sm:$0xff] }
 0xb1d   : > { %2082 = vpow2.f32 %v1504_v13  ;;  %1512 = vadd.xlane.f32.xlu0 %v1511_v25  ;;  %v1698_v25 = vld [vmem:[%s2737_s27 + $0x30] sm:$0xff] }
 0xb20   : > { %v1495_v14 = vpop.xlane.xlu2 %1494 }
 0xb21   : > { %v1499_v15 = vsub.f32 %v1482_v2, %v1495_v14  ;;  %v1706_v2 = vld [vmem:[%s2737_s27 + $0x70] sm:$0xff] }
 0xb22   : > { %1713 = vmatpush.msrb.mxu3 %v1706_v2 }
 0xb23   : > { %v2083_v17 = vpop.eup %2082  ;;  %v1506_v18 = vmul.f32 1.442695, %v1499_v15  ;;  %v1697_v15 = vld [vmem:[%s2737_s27 + $0x28] sm:$0xff] }
 0xb24   : > { %1929 = vmatmul.msk.f32.gmra.mxu3 %vm966_vm7, %v2083_v17  ;;  %v1514_v19 = vsel %vm966_vm7, %v2083_v17, 0.0 }
 0xb25   : > { %2084 = vpow2.f32 %v1506_v18  ;;  %1515 = vadd.xlane.f32.xlu2 %v1514_v19  ;;  %1714 = vmatpush.msrb.mxu3 %v1705_v12  ;;  %v1696_v18 = vld [vmem:[%s2737_s27 + $0x20] sm:$0xff] }
 0xb27   : > { %1715 = vmatpush.msrb.mxu3 %v1704_v6 }
 0xb29   : > { %1716 = vmatpush.msrb.mxu3 %v1703_v7 }
 0xb2b   : > { %v2085_v21 = vpop.eup %2084  ;;  %1717 = vmatpush.msrb.mxu3 %v1702_v8 }
 0xb2c   : > { %1930 = vmatmul.msk.f32.gmra.mxu3 %vm966_vm7, %v2085_v21  ;;  %v1517_v24 = vsel %vm966_vm7, %v2085_v21, 0.0  ;;  %v1695_v21 = vld [vmem:[%s2737_s27 + $0x18] sm:$0xff] }
 0xb2d   : > { %1509 = vadd.xlane.f32.xlu2 %v1508_v22  ;;  %1518 = vadd.xlane.f32.xlu0 %v1517_v24  ;;  %v2047_v24 = vld [vmem:[%s2738_s10] ss:$0 sm:$0xff] }
 0xb2e   : > { %1718 = vmatpush.msrb.mxu3 %v1701_v9 }
 0xb30   : > { %1719 = vmatpush.msrb.mxu3 %v1700_v20 }
 0xb32   : > { %1720 = vmatpush.msrb.mxu3 %v1699_v11 }
 0xb34   : > { %1721 = vmatpush.msrb.mxu3 %v1698_v25 }
 0xb36   : > { %1722 = vmatpush.msrb.mxu3 %v1697_v15 }
 0xb38   : > { %1723 = vmatpush.msrb.mxu3 %v1696_v18 }
 0xb3a   : > { %1724 = vmatpush.msrb.mxu3 %v1695_v21 }
 0xb3c   : > { %1725 = vmatpush.msrb.mxu3 %v1694_v26 }
 0xb90   : > { %v1513_v23 = vpop.xlane.xlu0 %1512 }
 0xb91   : > { %2086 = vrcp.f32 %v1513_v23 }
 0xb97   : > { %v1561_v28 = vpop.f32.mrf.mxu3  ;;  %v2087_v30 = vpop.eup %2086 }
 0xb98   : > { %v1516_v29 = vpop.xlane.xlu2 %1515 }
 0xb99   : > { %2088 = vrcp.f32 %v1516_v29 }
 0xb9f   : > { %v1564_v32 = vpop.f32.mrf.mxu3  ;;  %v2089_v35 = vpop.eup %2088 }
 0xba0   : > { %v1578_v33 = vmul.f32 %v2087_v30, %v1564_v32  ;;  %v1519_v34 = vpop.xlane.xlu0 %1518  ;;  %v1510_v43 = vpop.xlane.xlu2 %1509  ;;  %v1693_v32 = vld [vmem:[%s2737_s27 + $0x8] sm:$0xff] }
 0xba1   : > { %2090 = vrcp.f32 %v1519_v34  ;;  %1726 = vmatpush.msrb.mxu3 %v1693_v32  ;;  %v2049_v34 = vld [vmem:[%s2740_s0] ss:$0 sm:$0xff] }
 0xba2   : > { %1582 = vrot.lane.b32.xlu1 %v1578_v33, %s2213_s11  ;;  %2092 = vrcp.f32 %v1510_v43  ;;  %v1692_v33 = vld [vmem:[%s2737_s27] sm:$0xff]  ;;  %s2743_s11 = sld [smem:[#allocation21_spill]] }
 0xba3   : > { %1727 = vmatpush.msrb.mxu3 %v1692_v33 }
 0xba7   : > { %v1567_v36 = vpop.f32.mrf.mxu3  ;;  %v2091_v38 = vpop.eup %2090 }
 0xba8   : > { %v1579_v37 = vmul.f32 %v2089_v35, %v1567_v36  ;;  %v2093_v44 = vpop.eup %2092 }
 0xba9   : > { %v1577_v46 = vmul.f32 %v2093_v44, %v1561_v28  ;;  %v2048_v28 = vld [vmem:[%s2739_s12] ss:$0 sm:$0xff]  ;;  %s1808_s12 = scalar_lea.hbm %s2747_s2, %s1935_s22 }
 0xbaa   : > { %1586 = vrot.lane.b32.xlu0 %v1579_v37, %s2214_s15  ;;  %s2744_s15 = sld [smem:[#allocation22_spill]]  ;;  %s1812_s3 = sshll.u32 %s1808_s12, 4  ;;  %s1813_s3 = int_to_ptr.hbm [resolvable:$true] %s1812_s3 }
 0xbaf   : > { %v1570_v39 = vpop.f32.mrf.mxu3 }
 0xbb0   : > { %v1580_v40 = vmul.f32 %v2091_v38, %v1570_v39  ;;  %v2050_v38 = vld [vmem:[%s2741_s5] ss:$0 sm:$0xff] }
 0xbb2   : > { %1590 = vrot.lane.b32.xlu2 %v1580_v40, %s2215_s18  ;;  %s2745_s18 = sld [smem:[#allocation27_spill]] }
 0xbb8   : > { %s888_s20 = sand.u32 1, %s2745_s18   ;;  %s2130_s18 = scalar_lea.hbm %s2747_s2, 16 }
 0xbb9   : > { %s1901_s16 = sshll.u32 %s888_s20, 3 }
 0xbba   : > { %s890_s0 = scalar_lea.vmem [#allocation4], %s1901_s16 }
 0xbbb   : > { %s1810_s5 = sshll.u32 %s890_s0, 4  ;;  %s1811_s5 = int_to_ptr.vmem [resolvable:$true] %s1810_s5 }
 0xc0c   : > { %v1591_v49 = vpop.permute.xlu2 %1590 }
 0xc14   : > { %v1583_v45 = vpop.permute.xlu1 %1582 }
 0xc15   : > { %v1593_v47 = vsel %vm1053_vm12, %v1577_v46, %v1583_v45 }
 0xc1c   : > { %v1587_v48 = vpop.permute.xlu0 %1586 }
 0xc1d   : > { %v1594_v50 = vsel %vm1213_vm13, %v1593_v47, %v1587_v48  ;;  %v1768_v48 = vld [vmem:[%s2742_s28 + $0x18] sm:$0xff] }
 0xc1e   : > { %v1595_v51 = vsel %vm1215_vm14, %v1594_v50, %v1591_v49  ;;  %1788 = vmatpush.msra.mxu1 %v1768_v48  ;;  %v1767_v49 = vld [vmem:[%s2742_s28 + $0x10] sm:$0xff]  ;;  %v1766_v50 = vld [vmem:[%s2742_s28 + $0x8] sm:$0xff] }
 0xc1f   : > { %1931 = vmatmul.msk.f32.vlgmr.msrb.gmra.mxu1 %vm966_vm7, %v1595_v51  ;;  %v1765_v51 = vld [vmem:[%s2742_s28] sm:$0xff] }
 0xc20   : > { %1789 = vmatpush.msra.mxu1 %v1767_v49 }
 0xc22   : > { %1790 = vmatpush.msra.mxu1 %v1766_v50 }
 0xc24   : > { %1791 = vmatpush.msra.mxu1 %v1765_v51 }
 0xc9c   : > { %v1624_v53 = vpop.f32.mrf.mxu1 }
 0xc9d   : > { %v1625_v54 = vadd.f32 %v2046_v52, %v1624_v53 }
 0xc9f   : > { %v2607_v55 = vadd.f32 %v1625_v54, %v2546_v5  ;;  %v1662_v5 = vld [vmem:[%s2735_s23 + $0x10] sm:$0xff] }
 0xca0   : > { %1684 = vmatpush.msra.mxu2 %v1662_v5 }
 0xca1   : > { %v1630_v56 = vsel %vm966_vm7, %v2607_v55, 0.0 }
 0xca2   : > { %1631 = vadd.xlane.f32.xlu0 %v1630_v56  ;;  %1685 = vmatpush.msra.mxu2 %v1661_v63  ;;  %v2052_v63 = vld [vmem:[%s2744_s15] ss:$0 sm:$0xff]  ;;  %s2124_s15 = sshra.s32 %s1813_s3, 4  ;;  %s2125_s15 = int_to_ptr.hbm [resolvable:$true] %s2124_s15 }
 0xca3   : > { %s2126_s4 = scalar_lea.hbm %s2125_s15, 8  ;;  %p2131_p4 = scmp.lt.s32.totalorder %s2125_s15, %s2747_s2 }
 0xca4   : > { %1686 = vmatpush.msra.mxu2 %v1660_v0  ;;  %p2127_p1 = scmp.ne.s32.totalorder %s2125_s15, %s2126_s4  ;;  %p2132_p5 = scmp.lt.s32.totalorder %s2130_s18, %s2126_s4 }
 0xca6   : > { %p2128_p2 = pnand %p2127_p1, %p2417_p10  ;;  %p2133_p6 = por %p2132_p5, %p2131_p4 }
 0xca8   : > { %p2129_p3 = pneg %p2128_p2 }
 0xcaa   : > { %p2134_p7 = pnand %p2133_p6, %p2129_p3 }
 0xd15   : > { %v1632_v57 = vpop.xlane.xlu0 %1631 }
 0xd16   : > { %v1633_v58 = vmul.f32 %v1632_v57, %v2441_v31 }
 0xd18   : > { %v1634_v59 = vsub.f32 %v2607_v55, %v1633_v58 }
 0xd1a   : > { %v1635_v60 = vmul.f32 %v1634_v59, %v1634_v59 }
 0xd1c   : > { %v1636_v61 = vsel %vm966_vm7, %v1635_v60, 0.0 }
 0xd1d   : > { %1637 = vadd.xlane.f32.xlu1 %v1636_v61  ;;  %v2051_v61 = vld [vmem:[%s2743_s11] ss:$0 sm:$0xff]  ;;  %s1798_s11 = scalar_lea.sflag [#allocation5], %s888_s20 }
 0xd90   : > { %v1638_v3 = vpop.xlane.xlu1 %1637 }
 0xd91   : > { %v1639_v4 = vmul.f32 %v1638_v3, %v2441_v31 }
 0xd93   : > { %v1640_v16 = vadd.f32 1e-05, %v1639_v4 }
 0xd95   : > { %2094 = vrsqrt.f32 %v1640_v16  ;;  %vm1647_vm6 = vweird.f32 %v1640_v16 }
 0xd9b   : > { %v2095_v10 = vpop.eup %2094 }
 0xd9c   : > { %v1642_v13 = vmul.f32 %v2095_v10, %v1640_v16  ;;  %vm1648_vm5 = vweird.f32 %v2095_v10 }
 0xd9d   : > { %vm1649_vm8 = vmor %vm1647_vm6, %vm1648_vm5 }
 0xd9e   : > { %v1643_v14 = vmul.f32 %v2095_v10, %v1642_v13 }
 0xda0   : > { %v1644_v17 = vmul.f32 0.5, %v1643_v14 }
 0xda2   : > { %v1645_v19 = vsub.f32 1.5, %v1644_v17 }
 0xda4   : > { %v1646_v22 = vmul.f32 %v2095_v10, %v1645_v19 }
 0xda6   : > { %v1650_v27 = vsel %vm1649_vm8, %v2095_v10, %v1646_v22 }
 0xda7   : > { %v1651_v23 = vmul.f32 %v1650_v27, %v1634_v59 }
 0xda9   : > { %v1655_v29 = vmul.f32 %v2047_v24, %v1651_v23 }
 0xdab   : > { %v1659_v30 = vadd.f32 %v2048_v28, %v1655_v29 }
 0xdad   : > { %1932 = vmatmul.msk.f32.vlgmr.msra.gmra.mxu2 %vm966_vm7, %v1659_v30 }
 0xe30   : > { %v1688_v35 = vpop.f32.mrf.mxu2 }
 0xe31   : > { %v1689_v36 = vadd.f32 %v2049_v34, %v1688_v35 }
 0xe33   : > { %v1691_v37 = vmax.f32 %v1689_v36, 0.0 }
 0xe35   : > { %1728 = vmatmul.f32.vlgmr.msrb.gmra.mxu3 %v1691_v37 }
 0xeb8   : > { %v1729_v39 = vpop.f32.mrf.mxu3 }
 0xeb9   : > { %v1730_v40 = vadd.f32 %v2050_v38, %v1729_v39 }
 0xebb   : > { %v1732_v41 = vadd.f32 %v1730_v40, %v2607_v55 }
 0xebd   : > { %v1735_v42 = vsel %vm966_vm7, %v1732_v41, 0.0 }
 0xebe   : > { %1736 = vadd.xlane.f32.xlu2 %v1735_v42 }
 0xf31   : > { %v1737_v43 = vpop.xlane.xlu2 %1736 }
 0xf32   : > { %v1738_v44 = vmul.f32 %v1737_v43, %v2441_v31 }
 0xf34   : > { %v1739_v45 = vsub.f32 %v1732_v41, %v1738_v44 }
 0xf36   : > { %v1740_v46 = vmul.f32 %v1739_v45, %v1739_v45 }
 0xf38   : > { %v1741_v47 = vsel %vm966_vm7, %v1740_v46, 0.0 }
 0xf39   : > { %1742 = vadd.xlane.f32.xlu0 %v1741_v47 }
 0xfac   : > { %v1743_v52 = vpop.xlane.xlu0 %1742 }
 0xfad   : > { %v1744_v53 = vmul.f32 %v1743_v52, %v2441_v31 }
 0xfaf   : > { %v1745_v54 = vadd.f32 1e-05, %v1744_v53 }
 0xfb1   : > { %2096 = vrsqrt.f32 %v1745_v54  ;;  %vm1752_vm10 = vweird.f32 %v1745_v54 }
 0xfb7   : > { %v2097_v55 = vpop.eup %2096 }
 0xfb8   : > { %v1747_v56 = vmul.f32 %v2097_v55, %v1745_v54  ;;  %vm1753_vm9 = vweird.f32 %v2097_v55 }
 0xfb9   : > { %vm1754_vm11 = vmor %vm1752_vm10, %vm1753_vm9 }
 0xfba   : > { %v1748_v57 = vmul.f32 %v2097_v55, %v1747_v56 }
 0xfbc   : > { %v1749_v58 = vmul.f32 0.5, %v1748_v57 }
 0xfbe   : > { %v1750_v59 = vsub.f32 1.5, %v1749_v58 }
 0xfc0   : > { %v1751_v60 = vmul.f32 %v2097_v55, %v1750_v59 }
 0xfc2   : > { %v1755_v62 = vsel %vm1754_vm11, %v2097_v55, %v1751_v60 }
 0xfc3   : > { %v1756_v5 = vmul.f32 %v1755_v62, %v1739_v45 }
 0xfc5   : > { %v1760_v31 = vmul.f32 %v2051_v61, %v1756_v5 }
 0xfc7   : > { %v1764_v0 = vadd.f32 %v2052_v63, %v1760_v31 }
 0xfc9   : > { %1933 = vmatmul.msk.f32.vlgmr.msra.gmra.mxu1 %vm966_vm7, %v1764_v0 }
0x1046   : > { %v1793_v2 = vpop.f32.mrf.mxu1 }
0x1047   : > { %v1794_v12 = vadd.f32 %v2053_v1, %v1793_v2 }
0x1049   : > { %1796 = vst [vmem:[%s890_s0] sm:$0xff] %v1794_v12 }
0x104a   : > { %2137 = shalt.err (!%p2134_p7)
}
0x104b   : > { %1938 = dma.vmem_to_hbm [thread:$0]  (%p2417_p10), %s1811_s5, 128, %s1813_s3, %s1798_s11  }
0x104c PF: > { %s2750_s1 = sld [smem:[#allocation29_spill]] }
0x104d   : > { %s2751_s7 = sld [smem:[#allocation26_spill]] }
0x1052   : > { %p1944_p8 = scmp.ge.s32.totalorder %s2750_s1, 2 }
0x1053   : > { %s1824_s16 = sand.u32 1, %s2751_s7  }
0x1054   : > { %p1941_p9 = pnand %p1944_p8, %p2421_p11  ;;  %s1825_s22 = scalar_lea.sflag [#allocation5], %s1824_s16 }
0x1056   : > { %p1942_p12 = pneg %p1941_p9 }
0x1058   : > { %2157 = dma.done.wait (%p1942_p12), %s1825_s22, 128  }
0x1059   : > { %2159 = vsyncadd (%p1942_p12), %s1825_s22, 4294967168  ;;  %s2753_s22 = sld [smem:[#allocation31_spill]] }
0x105a   : > { %s2754_s16 = sld [smem:[#allocation27_spill]] }
0x105b   : > { %s2755_s0 = sld [smem:[#allocation28_spill]] }
0x105c   : > { %s2756_s20 = sld [smem:[#allocation32_spill]] }
0x105f   : > { %p79_p13 = scmp.ge.s32.totalorder %s2753_s22, 4  }
0x1061   :  { %81 = sbr.rel (!%p79_p13) target bundleno = 63 (0x3f), region = 206 }
0x1066   :  { %1831 = vsyncpa [#allocation5], 1 }
0x1067   :  { %1833 = vsyncpa [#allocation5 + $0x1], 1 }

</bundles_post_ra>
